<compile_context>
chip_gen: v5e
topology: v5e:2x2
jax: 0.10.0
libtpu: 0.0.40
codegen_flags: <defaults>
</compile_context>

<pallas_src>
import jax
import jax.numpy as jnp
import numpy as np
from jax.experimental import pallas as pl
from jax.experimental.pallas import tpu as pltpu

C_IN = 3
# TODO(synk): the original module declares conv1 as Conv2d(3, 8), but
# v1 + v2 (8ch + 4ch) and conv3 (4->6 in) are shape-inconsistent, so the
# PyTorch forward cannot actually run; conv1 is taken as 3->4 here so the
# graph is well-formed (documented semantic deviation).
C_MID = 4
C_OUT = 6


def _hswish(v):
    return v * jnp.clip(v + 3.0, 0.0, 6.0) * (1.0 / 6.0)


def _make_kernel(hp, wp, c_blk):
    def kernel(w_ref, cb_ref, hb3_ref, x_ref, o_ref):
        # w_ref  : SMEM (C_IN, C_OUT)    fused weights
        # cb_ref : SMEM (C_OUT,)         fused bias
        # hb3_ref: SMEM (C_OUT,)         hardswish(b3) for the outer ring
        # x_ref  : VMEM (C_IN, hp, wp)   zero-padded input image
        # o_ref  : VMEM (c_blk, hp, wp)  this block's output channels
        j = pl.program_id(1)                       # channel-split index
        x = x_ref[...]                             # (C_IN, hp, wp)
        row = jax.lax.broadcasted_iota(jnp.int32, (hp, wp), 0)
        col = jax.lax.broadcasted_iota(jnp.int32, (hp, wp), 1)
        outer = (row == 0) | (row == hp - 1) | (col == 0) | (col == wp - 1)
        for cc in range(c_blk):                    # fully unrolled
            c = j * c_blk + cc                     # global output channel
            acc = (cb_ref[c]
                   + w_ref[0, c] * x[0]
                   + w_ref[1, c] * x[1]
                   + w_ref[2, c] * x[2])           # scalar x vector FMAs
            hsw = acc * jnp.clip(acc + 3.0, 0.0, 6.0) * (1.0 / 6.0)
            o_ref[cc] = jnp.where(outer, hb3_ref[c], hsw)
    return kernel


def _channel_splits():
    # 2 parallel output-channel blocks on dual-TensorCore chips (v7x);
    # 1 block elsewhere (v5e/v6e: single core, extra grid steps = overhead).
    try:
        kind = jax.devices()[0].device_kind.lower()
    except Exception:
        return 1
    return 2 if ("v7" in kind or "7x" in kind) else 1


def model_forward(x_nchw, params):
    w1, b1, w2, b2, w3, b3 = params
    n, c, h, w = x_nchw.shape
    assert c == C_IN
    hp, wp = h + 4, w + 4
    hi = jax.lax.Precision.HIGHEST

    # Tiny algebraic fusion of the three 1x1 convs (fused by XLA under jit).
    w_fused = jnp.dot(w1 + w2, w3, precision=hi)                   # (C_IN, C_OUT)
    cb = (jnp.dot(b1 + b2, w3, precision=hi) + b3).reshape(C_OUT)  # (C_OUT,)
    hb3 = _hswish(b3).reshape(C_OUT)                               # (C_OUT,)

    # Single pad op; padded pixels yield hardswish(cb) = inner output ring.
    x_pad = jnp.pad(x_nchw, ((0, 0), (0, 0), (2, 2), (2, 2)))

    nsplit = _channel_splits()
    c_blk = C_OUT // nsplit
    kernel = _make_kernel(hp, wp, c_blk)

    return pl.pallas_call(
        kernel,
        out_shape=jax.ShapeDtypeStruct((n, C_OUT, hp, wp), jnp.float32),
        grid=(n, nsplit),
        in_specs=[
            pl.BlockSpec(memory_space=pltpu.MemorySpace.SMEM),     # w_fused
            pl.BlockSpec(memory_space=pltpu.MemorySpace.SMEM),     # cb
            pl.BlockSpec(memory_space=pltpu.MemorySpace.SMEM),     # hswish(b3)
            pl.BlockSpec((None, C_IN, hp, wp), lambda b, j: (b, 0, 0, 0)),
        ],
        out_specs=pl.BlockSpec((None, c_blk, hp, wp), lambda b, j: (b, j, 0, 0)),
        compiler_params=pltpu.CompilerParams(
            dimension_semantics=("parallel", "parallel")),
    )(w_fused, cb, hb3, x_pad)


def reference(x_nchw, params):
    """Pure-JAX reference (XLA convs) for correctness checking."""
    w1, b1, w2, b2, w3, b3 = params

    def conv1x1_pad1(x, wgt, bias):
        wk = jnp.transpose(wgt)[:, :, None, None]          # (Cout, Cin, 1, 1)
        y = jax.lax.conv_general_dilated(
            x, wk, (1, 1), ((1, 1), (1, 1)),
            dimension_numbers=("NCHW", "OIHW", "NCHW"),
            precision=jax.lax.Precision.HIGHEST)
        return y + bias.reshape(1, -1, 1, 1)

    v1 = conv1x1_pad1(x_nchw, w1, b1)
    v2 = conv1x1_pad1(x_nchw, w2, b2)
    v3 = v1 + v2
    v4 = conv1x1_pad1(v3, w3, b3)
    v7 = jnp.clip(v4 + 3.0, 0.0, 6.0)
    return v4 * v7 / 6.0


if __name__ == "__main__":
    key = jax.random.PRNGKey(0)
    k = jax.random.split(key, 7)
    x = jax.random.normal(k[0], (1, 3, 64, 64), jnp.float32)
    # Deterministic synthetic parameters (1x1 conv weights stored as (Cin, Cout)).
    w1 = jax.random.normal(k[1], (C_IN, C_MID), jnp.float32) * 0.3
    b1 = jax.random.normal(k[2], (1, C_MID), jnp.float32) * 0.1
    w2 = jax.random.normal(k[3], (C_IN, C_MID), jnp.float32) * 0.3
    b2 = jax.random.normal(k[4], (1, C_MID), jnp.float32) * 0.1
    w3 = jax.random.normal(k[5], (C_MID, C_OUT), jnp.float32) * 0.3
    b3 = jax.random.normal(k[6], (1, C_OUT), jnp.float32) * 0.1
    params = (w1, b1, w2, b2, w3, b3)

    fwd = jax.jit(model_forward)
    out = jax.block_until_ready(fwd(x, params))
    ref = jax.block_until_ready(reference(x, params))

    assert out.shape == (1, C_OUT, 68, 68), out.shape
    np.testing.assert_allclose(np.asarray(out), np.asarray(ref), rtol=1e-4, atol=1e-4)
    print("KERNEL_OK")
</pallas_src>

<mosaic_0001>
module attributes {stable_mosaic.version = 11 : i64} {
  func.func @kernel(%arg0: i32, %arg1: i32, %arg2: memref<3x6xf32, #tpu.memory_space<smem>>, %arg3: memref<6xf32, #tpu.memory_space<smem>>, %arg4: memref<6xf32, #tpu.memory_space<smem>>, %arg5: memref<1x3x68x68xf32, #tpu.memory_space<vmem>>, %arg6: memref<1x6x68x68xf32, #tpu.memory_space<vmem>>) attributes {dimension_semantics = [#tpu.dimension_semantics<parallel>, #tpu.dimension_semantics<parallel>], iteration_bounds = array<i64: 1, 1>, scalar_prefetch = 0 : i64, scratch_operands = 0 : i64, tpu.core_type = #tpu.core_type<tc>, window_params = [{transform_indices = @transform_0, window_bounds = array<i64: 3, 6>}, {transform_indices = @transform_1, window_bounds = array<i64: 6>}, {transform_indices = @transform_2, window_bounds = array<i64: 6>}, {transform_indices = @transform_3, window_bounds = array<i64: 1, 3, 68, 68>}, {transform_indices = @transform_4, window_bounds = array<i64: 1, 6, 68, 68>}]} {
    %c0 = arith.constant 0 : index
    %c0_0 = arith.constant 0 : index
    %c0_1 = arith.constant 0 : index
    %c0_2 = arith.constant 0 : index
    %0 = vector.load %arg5[%c0, %c0_0, %c0_1, %c0_2] : memref<1x3x68x68xf32, #tpu.memory_space<vmem>>, vector<1x3x68x68xf32>
    %1 = vector.shape_cast %0 : vector<1x3x68x68xf32> to vector<3x68x68xf32>
    %2 = tpu.iota {dimensions = array<i32: 0>} : vector<68x68xi32>
    %3 = tpu.iota {dimensions = array<i32: 1>} : vector<68x68xi32>
    %c0_i32 = arith.constant 0 : i32
    %4 = vector.broadcast %c0_i32 : i32 to vector<68x68xi32>
    %5 = arith.cmpi eq, %2, %4 : vector<68x68xi32>
    %c67_i32 = arith.constant 67 : i32
    %6 = vector.broadcast %c67_i32 : i32 to vector<68x68xi32>
    %7 = arith.cmpi eq, %2, %6 : vector<68x68xi32>
    %8 = arith.ori %5, %7 : vector<68x68xi1>
    %c0_i32_3 = arith.constant 0 : i32
    %9 = vector.broadcast %c0_i32_3 : i32 to vector<68x68xi32>
    %10 = arith.cmpi eq, %3, %9 : vector<68x68xi32>
    %11 = arith.ori %8, %10 : vector<68x68xi1>
    %c67_i32_4 = arith.constant 67 : i32
    %12 = vector.broadcast %c67_i32_4 : i32 to vector<68x68xi32>
    %13 = arith.cmpi eq, %3, %12 : vector<68x68xi32>
    %14 = arith.ori %11, %13 : vector<68x68xi1>
    %c6_i32 = arith.constant 6 : i32
    %15 = arith.muli %arg1, %c6_i32 : i32
    %c0_i32_5 = arith.constant 0 : i32
    %16 = arith.addi %15, %c0_i32_5 : i32
    %17 = arith.index_cast %16 : i32 to index
    %18 = memref.load %arg3[%17] : memref<6xf32, #tpu.memory_space<smem>>
    %c0_6 = arith.constant 0 : index
    %19 = arith.index_cast %16 : i32 to index
    %20 = memref.load %arg2[%c0_6, %19] : memref<3x6xf32, #tpu.memory_space<smem>>
    %21 = vector.extract_strided_slice %1 {offsets = [0, 0, 0], sizes = [1, 68, 68], strides = [1, 1, 1]} : vector<3x68x68xf32> to vector<1x68x68xf32>
    %22 = vector.shape_cast %21 : vector<1x68x68xf32> to vector<68x68xf32>
    %23 = vector.broadcast %20 : f32 to vector<68x68xf32>
    %24 = arith.mulf %23, %22 : vector<68x68xf32>
    %25 = vector.broadcast %18 : f32 to vector<68x68xf32>
    %26 = arith.addf %25, %24 : vector<68x68xf32>
    %c1 = arith.constant 1 : index
    %27 = arith.index_cast %16 : i32 to index
    %28 = memref.load %arg2[%c1, %27] : memref<3x6xf32, #tpu.memory_space<smem>>
    %29 = vector.extract_strided_slice %1 {offsets = [1, 0, 0], sizes = [1, 68, 68], strides = [1, 1, 1]} : vector<3x68x68xf32> to vector<1x68x68xf32>
    %30 = vector.shape_cast %29 : vector<1x68x68xf32> to vector<68x68xf32>
    %31 = vector.broadcast %28 : f32 to vector<68x68xf32>
    %32 = arith.mulf %31, %30 : vector<68x68xf32>
    %33 = arith.addf %26, %32 : vector<68x68xf32>
    %c2 = arith.constant 2 : index
    %34 = arith.index_cast %16 : i32 to index
    %35 = memref.load %arg2[%c2, %34] : memref<3x6xf32, #tpu.memory_space<smem>>
    %36 = vector.extract_strided_slice %1 {offsets = [2, 0, 0], sizes = [1, 68, 68], strides = [1, 1, 1]} : vector<3x68x68xf32> to vector<1x68x68xf32>
    %37 = vector.shape_cast %36 : vector<1x68x68xf32> to vector<68x68xf32>
    %38 = vector.broadcast %35 : f32 to vector<68x68xf32>
    %39 = arith.mulf %38, %37 : vector<68x68xf32>
    %40 = arith.addf %33, %39 : vector<68x68xf32>
    %cst = arith.constant 3.000000e+00 : f32
    %41 = vector.broadcast %cst : f32 to vector<68x68xf32>
    %42 = arith.addf %40, %41 : vector<68x68xf32>
    %cst_7 = arith.constant 0.000000e+00 : f32
    %cst_8 = arith.constant 6.000000e+00 : f32
    %43 = vector.broadcast %cst_7 : f32 to vector<68x68xf32>
    %44 = arith.maximumf %43, %42 : vector<68x68xf32>
    %45 = vector.broadcast %cst_8 : f32 to vector<68x68xf32>
    %46 = arith.minimumf %45, %44 : vector<68x68xf32>
    %47 = arith.mulf %40, %46 : vector<68x68xf32>
    %cst_9 = arith.constant 0.166666672 : f32
    %48 = vector.broadcast %cst_9 : f32 to vector<68x68xf32>
    %49 = arith.mulf %47, %48 : vector<68x68xf32>
    %50 = arith.index_cast %16 : i32 to index
    %51 = memref.load %arg4[%50] : memref<6xf32, #tpu.memory_space<smem>>
    %52 = vector.broadcast %51 : f32 to vector<68x68xf32>
    %53 = arith.select %14, %52, %49 : vector<68x68xi1>, vector<68x68xf32>
    %c0_10 = arith.constant 0 : index
    %c0_11 = arith.constant 0 : index
    %c0_12 = arith.constant 0 : index
    %c0_13 = arith.constant 0 : index
    %54 = vector.load %arg6[%c0_10, %c0_11, %c0_12, %c0_13] : memref<1x6x68x68xf32, #tpu.memory_space<vmem>>, vector<1x1x68x68xf32>
    %55 = vector.shape_cast %54 : vector<1x1x68x68xf32> to vector<68x68xf32>
    %56 = vector.shape_cast %53 : vector<68x68xf32> to vector<1x1x68x68xf32>
    tpu.vector_store %arg6[%c0_10, %c0_11, %c0_12, %c0_13], %56 {strides = array<i32>} : memref<1x6x68x68xf32, #tpu.memory_space<vmem>>, vector<1x1x68x68xf32>,
    %c6_i32_14 = arith.constant 6 : i32
    %57 = arith.muli %arg1, %c6_i32_14 : i32
    %c1_i32 = arith.constant 1 : i32
    %58 = arith.addi %57, %c1_i32 : i32
    %59 = arith.index_cast %58 : i32 to index
    %60 = memref.load %arg3[%59] : memref<6xf32, #tpu.memory_space<smem>>
    %c0_15 = arith.constant 0 : index
    %61 = arith.index_cast %58 : i32 to index
    %62 = memref.load %arg2[%c0_15, %61] : memref<3x6xf32, #tpu.memory_space<smem>>
    %63 = vector.extract_strided_slice %1 {offsets = [0, 0, 0], sizes = [1, 68, 68], strides = [1, 1, 1]} : vector<3x68x68xf32> to vector<1x68x68xf32>
    %64 = vector.shape_cast %63 : vector<1x68x68xf32> to vector<68x68xf32>
    %65 = vector.broadcast %62 : f32 to vector<68x68xf32>
    %66 = arith.mulf %65, %64 : vector<68x68xf32>
    %67 = vector.broadcast %60 : f32 to vector<68x68xf32>
    %68 = arith.addf %67, %66 : vector<68x68xf32>
    %c1_16 = arith.constant 1 : index
    %69 = arith.index_cast %58 : i32 to index
    %70 = memref.load %arg2[%c1_16, %69] : memref<3x6xf32, #tpu.memory_space<smem>>
    %71 = vector.extract_strided_slice %1 {offsets = [1, 0, 0], sizes = [1, 68, 68], strides = [1, 1, 1]} : vector<3x68x68xf32> to vector<1x68x68xf32>
    %72 = vector.shape_cast %71 : vector<1x68x68xf32> to vector<68x68xf32>
    %73 = vector.broadcast %70 : f32 to vector<68x68xf32>
    %74 = arith.mulf %73, %72 : vector<68x68xf32>
    %75 = arith.addf %68, %74 : vector<68x68xf32>
    %c2_17 = arith.constant 2 : index
    %76 = arith.index_cast %58 : i32 to index
    %77 = memref.load %arg2[%c2_17, %76] : memref<3x6xf32, #tpu.memory_space<smem>>
    %78 = vector.extract_strided_slice %1 {offsets = [2, 0, 0], sizes = [1, 68, 68], strides = [1, 1, 1]} : vector<3x68x68xf32> to vector<1x68x68xf32>
    %79 = vector.shape_cast %78 : vector<1x68x68xf32> to vector<68x68xf32>
    %80 = vector.broadcast %77 : f32 to vector<68x68xf32>
    %81 = arith.mulf %80, %79 : vector<68x68xf32>
    %82 = arith.addf %75, %81 : vector<68x68xf32>
    %cst_18 = arith.constant 3.000000e+00 : f32
    %83 = vector.broadcast %cst_18 : f32 to vector<68x68xf32>
    %84 = arith.addf %82, %83 : vector<68x68xf32>
    %cst_19 = arith.constant 0.000000e+00 : f32
    %cst_20 = arith.constant 6.000000e+00 : f32
    %85 = vector.broadcast %cst_19 : f32 to vector<68x68xf32>
    %86 = arith.maximumf %85, %84 : vector<68x68xf32>
    %87 = vector.broadcast %cst_20 : f32 to vector<68x68xf32>
    %88 = arith.minimumf %87, %86 : vector<68x68xf32>
    %89 = arith.mulf %82, %88 : vector<68x68xf32>
    %cst_21 = arith.constant 0.166666672 : f32
    %90 = vector.broadcast %cst_21 : f32 to vector<68x68xf32>
    %91 = arith.mulf %89, %90 : vector<68x68xf32>
    %92 = arith.index_cast %58 : i32 to index
    %93 = memref.load %arg4[%92] : memref<6xf32, #tpu.memory_space<smem>>
    %94 = vector.broadcast %93 : f32 to vector<68x68xf32>
    %95 = arith.select %14, %94, %91 : vector<68x68xi1>, vector<68x68xf32>
    %c0_22 = arith.constant 0 : index
    %c1_23 = arith.constant 1 : index
    %c0_24 = arith.constant 0 : index
    %c0_25 = arith.constant 0 : index
    %96 = vector.load %arg6[%c0_22, %c1_23, %c0_24, %c0_25] : memref<1x6x68x68xf32, #tpu.memory_space<vmem>>, vector<1x1x68x68xf32>
    %97 = vector.shape_cast %96 : vector<1x1x68x68xf32> to vector<68x68xf32>
    %98 = vector.shape_cast %95 : vector<68x68xf32> to vector<1x1x68x68xf32>
    tpu.vector_store %arg6[%c0_22, %c1_23, %c0_24, %c0_25], %98 {strides = array<i32>} : memref<1x6x68x68xf32, #tpu.memory_space<vmem>>, vector<1x1x68x68xf32>,
    %c6_i32_26 = arith.constant 6 : i32
    %99 = arith.muli %arg1, %c6_i32_26 : i32
    %c2_i32 = arith.constant 2 : i32
    %100 = arith.addi %99, %c2_i32 : i32
    %101 = arith.index_cast %100 : i32 to index
    %102 = memref.load %arg3[%101] : memref<6xf32, #tpu.memory_space<smem>>
    %c0_27 = arith.constant 0 : index
    %103 = arith.index_cast %100 : i32 to index
    %104 = memref.load %arg2[%c0_27, %103] : memref<3x6xf32, #tpu.memory_space<smem>>
    %105 = vector.extract_strided_slice %1 {offsets = [0, 0, 0], sizes = [1, 68, 68], strides = [1, 1, 1]} : vector<3x68x68xf32> to vector<1x68x68xf32>
    %106 = vector.shape_cast %105 : vector<1x68x68xf32> to vector<68x68xf32>
    %107 = vector.broadcast %104 : f32 to vector<68x68xf32>
    %108 = arith.mulf %107, %106 : vector<68x68xf32>
    %109 = vector.broadcast %102 : f32 to vector<68x68xf32>
    %110 = arith.addf %109, %108 : vector<68x68xf32>
    %c1_28 = arith.constant 1 : index
    %111 = arith.index_cast %100 : i32 to index
    %112 = memref.load %arg2[%c1_28, %111] : memref<3x6xf32, #tpu.memory_space<smem>>
    %113 = vector.extract_strided_slice %1 {offsets = [1, 0, 0], sizes = [1, 68, 68], strides = [1, 1, 1]} : vector<3x68x68xf32> to vector<1x68x68xf32>
    %114 = vector.shape_cast %113 : vector<1x68x68xf32> to vector<68x68xf32>
    %115 = vector.broadcast %112 : f32 to vector<68x68xf32>
    %116 = arith.mulf %115, %114 : vector<68x68xf32>
    %117 = arith.addf %110, %116 : vector<68x68xf32>
    %c2_29 = arith.constant 2 : index
    %118 = arith.index_cast %100 : i32 to index
    %119 = memref.load %arg2[%c2_29, %118] : memref<3x6xf32, #tpu.memory_space<smem>>
    %120 = vector.extract_strided_slice %1 {offsets = [2, 0, 0], sizes = [1, 68, 68], strides = [1, 1, 1]} : vector<3x68x68xf32> to vector<1x68x68xf32>
    %121 = vector.shape_cast %120 : vector<1x68x68xf32> to vector<68x68xf32>
    %122 = vector.broadcast %119 : f32 to vector<68x68xf32>
    %123 = arith.mulf %122, %121 : vector<68x68xf32>
    %124 = arith.addf %117, %123 : vector<68x68xf32>
    %cst_30 = arith.constant 3.000000e+00 : f32
    %125 = vector.broadcast %cst_30 : f32 to vector<68x68xf32>
    %126 = arith.addf %124, %125 : vector<68x68xf32>
    %cst_31 = arith.constant 0.000000e+00 : f32
    %cst_32 = arith.constant 6.000000e+00 : f32
    %127 = vector.broadcast %cst_31 : f32 to vector<68x68xf32>
    %128 = arith.maximumf %127, %126 : vector<68x68xf32>
    %129 = vector.broadcast %cst_32 : f32 to vector<68x68xf32>
    %130 = arith.minimumf %129, %128 : vector<68x68xf32>
    %131 = arith.mulf %124, %130 : vector<68x68xf32>
    %cst_33 = arith.constant 0.166666672 : f32
    %132 = vector.broadcast %cst_33 : f32 to vector<68x68xf32>
    %133 = arith.mulf %131, %132 : vector<68x68xf32>
    %134 = arith.index_cast %100 : i32 to index
    %135 = memref.load %arg4[%134] : memref<6xf32, #tpu.memory_space<smem>>
    %136 = vector.broadcast %135 : f32 to vector<68x68xf32>
    %137 = arith.select %14, %136, %133 : vector<68x68xi1>, vector<68x68xf32>
    %c0_34 = arith.constant 0 : index
    %c2_35 = arith.constant 2 : index
    %c0_36 = arith.constant 0 : index
    %c0_37 = arith.constant 0 : index
    %138 = vector.load %arg6[%c0_34, %c2_35, %c0_36, %c0_37] : memref<1x6x68x68xf32, #tpu.memory_space<vmem>>, vector<1x1x68x68xf32>
    %139 = vector.shape_cast %138 : vector<1x1x68x68xf32> to vector<68x68xf32>
    %140 = vector.shape_cast %137 : vector<68x68xf32> to vector<1x1x68x68xf32>
    tpu.vector_store %arg6[%c0_34, %c2_35, %c0_36, %c0_37], %140 {strides = array<i32>} : memref<1x6x68x68xf32, #tpu.memory_space<vmem>>, vector<1x1x68x68xf32>,
    %c6_i32_38 = arith.constant 6 : i32
    %141 = arith.muli %arg1, %c6_i32_38 : i32
    %c3_i32 = arith.constant 3 : i32
    %142 = arith.addi %141, %c3_i32 : i32
    %143 = arith.index_cast %142 : i32 to index
    %144 = memref.load %arg3[%143] : memref<6xf32, #tpu.memory_space<smem>>
    %c0_39 = arith.constant 0 : index
    %145 = arith.index_cast %142 : i32 to index
    %146 = memref.load %arg2[%c0_39, %145] : memref<3x6xf32, #tpu.memory_space<smem>>
    %147 = vector.extract_strided_slice %1 {offsets = [0, 0, 0], sizes = [1, 68, 68], strides = [1, 1, 1]} : vector<3x68x68xf32> to vector<1x68x68xf32>
    %148 = vector.shape_cast %147 : vector<1x68x68xf32> to vector<68x68xf32>
    %149 = vector.broadcast %146 : f32 to vector<68x68xf32>
    %150 = arith.mulf %149, %148 : vector<68x68xf32>
    %151 = vector.broadcast %144 : f32 to vector<68x68xf32>
    %152 = arith.addf %151, %150 : vector<68x68xf32>
    %c1_40 = arith.constant 1 : index
    %153 = arith.index_cast %142 : i32 to index
    %154 = memref.load %arg2[%c1_40, %153] : memref<3x6xf32, #tpu.memory_space<smem>>
    %155 = vector.extract_strided_slice %1 {offsets = [1, 0, 0], sizes = [1, 68, 68], strides = [1, 1, 1]} : vector<3x68x68xf32> to vector<1x68x68xf32>
    %156 = vector.shape_cast %155 : vector<1x68x68xf32> to vector<68x68xf32>
    %157 = vector.broadcast %154 : f32 to vector<68x68xf32>
    %158 = arith.mulf %157, %156 : vector<68x68xf32>
    %159 = arith.addf %152, %158 : vector<68x68xf32>
    %c2_41 = arith.constant 2 : index
    %160 = arith.index_cast %142 : i32 to index
    %161 = memref.load %arg2[%c2_41, %160] : memref<3x6xf32, #tpu.memory_space<smem>>
    %162 = vector.extract_strided_slice %1 {offsets = [2, 0, 0], sizes = [1, 68, 68], strides = [1, 1, 1]} : vector<3x68x68xf32> to vector<1x68x68xf32>
    %163 = vector.shape_cast %162 : vector<1x68x68xf32> to vector<68x68xf32>
    %164 = vector.broadcast %161 : f32 to vector<68x68xf32>
    %165 = arith.mulf %164, %163 : vector<68x68xf32>
    %166 = arith.addf %159, %165 : vector<68x68xf32>
    %cst_42 = arith.constant 3.000000e+00 : f32
    %167 = vector.broadcast %cst_42 : f32 to vector<68x68xf32>
    %168 = arith.addf %166, %167 : vector<68x68xf32>
    %cst_43 = arith.constant 0.000000e+00 : f32
    %cst_44 = arith.constant 6.000000e+00 : f32
    %169 = vector.broadcast %cst_43 : f32 to vector<68x68xf32>
    %170 = arith.maximumf %169, %168 : vector<68x68xf32>
    %171 = vector.broadcast %cst_44 : f32 to vector<68x68xf32>
    %172 = arith.minimumf %171, %170 : vector<68x68xf32>
    %173 = arith.mulf %166, %172 : vector<68x68xf32>
    %cst_45 = arith.constant 0.166666672 : f32
    %174 = vector.broadcast %cst_45 : f32 to vector<68x68xf32>
    %175 = arith.mulf %173, %174 : vector<68x68xf32>
    %176 = arith.index_cast %142 : i32 to index
    %177 = memref.load %arg4[%176] : memref<6xf32, #tpu.memory_space<smem>>
    %178 = vector.broadcast %177 : f32 to vector<68x68xf32>
    %179 = arith.select %14, %178, %175 : vector<68x68xi1>, vector<68x68xf32>
    %c0_46 = arith.constant 0 : index
    %c3 = arith.constant 3 : index
    %c0_47 = arith.constant 0 : index
    %c0_48 = arith.constant 0 : index
    %180 = vector.load %arg6[%c0_46, %c3, %c0_47, %c0_48] : memref<1x6x68x68xf32, #tpu.memory_space<vmem>>, vector<1x1x68x68xf32>
    %181 = vector.shape_cast %180 : vector<1x1x68x68xf32> to vector<68x68xf32>
    %182 = vector.shape_cast %179 : vector<68x68xf32> to vector<1x1x68x68xf32>
    tpu.vector_store %arg6[%c0_46, %c3, %c0_47, %c0_48], %182 {strides = array<i32>} : memref<1x6x68x68xf32, #tpu.memory_space<vmem>>, vector<1x1x68x68xf32>,
    %c6_i32_49 = arith.constant 6 : i32
    %183 = arith.muli %arg1, %c6_i32_49 : i32
    %c4_i32 = arith.constant 4 : i32
    %184 = arith.addi %183, %c4_i32 : i32
    %185 = arith.index_cast %184 : i32 to index
    %186 = memref.load %arg3[%185] : memref<6xf32, #tpu.memory_space<smem>>
    %c0_50 = arith.constant 0 : index
    %187 = arith.index_cast %184 : i32 to index
    %188 = memref.load %arg2[%c0_50, %187] : memref<3x6xf32, #tpu.memory_space<smem>>
    %189 = vector.extract_strided_slice %1 {offsets = [0, 0, 0], sizes = [1, 68, 68], strides = [1, 1, 1]} : vector<3x68x68xf32> to vector<1x68x68xf32>
    %190 = vector.shape_cast %189 : vector<1x68x68xf32> to vector<68x68xf32>
    %191 = vector.broadcast %188 : f32 to vector<68x68xf32>
    %192 = arith.mulf %191, %190 : vector<68x68xf32>
    %193 = vector.broadcast %186 : f32 to vector<68x68xf32>
    %194 = arith.addf %193, %192 : vector<68x68xf32>
    %c1_51 = arith.constant 1 : index
    %195 = arith.index_cast %184 : i32 to index
    %196 = memref.load %arg2[%c1_51, %195] : memref<3x6xf32, #tpu.memory_space<smem>>
    %197 = vector.extract_strided_slice %1 {offsets = [1, 0, 0], sizes = [1, 68, 68], strides = [1, 1, 1]} : vector<3x68x68xf32> to vector<1x68x68xf32>
    %198 = vector.shape_cast %197 : vector<1x68x68xf32> to vector<68x68xf32>
    %199 = vector.broadcast %196 : f32 to vector<68x68xf32>
    %200 = arith.mulf %199, %198 : vector<68x68xf32>
    %201 = arith.addf %194, %200 : vector<68x68xf32>
    %c2_52 = arith.constant 2 : index
    %202 = arith.index_cast %184 : i32 to index
    %203 = memref.load %arg2[%c2_52, %202] : memref<3x6xf32, #tpu.memory_space<smem>>
    %204 = vector.extract_strided_slice %1 {offsets = [2, 0, 0], sizes = [1, 68, 68], strides = [1, 1, 1]} : vector<3x68x68xf32> to vector<1x68x68xf32>
    %205 = vector.shape_cast %204 : vector<1x68x68xf32> to vector<68x68xf32>
    %206 = vector.broadcast %203 : f32 to vector<68x68xf32>
    %207 = arith.mulf %206, %205 : vector<68x68xf32>
    %208 = arith.addf %201, %207 : vector<68x68xf32>
    %cst_53 = arith.constant 3.000000e+00 : f32
    %209 = vector.broadcast %cst_53 : f32 to vector<68x68xf32>
    %210 = arith.addf %208, %209 : vector<68x68xf32>
    %cst_54 = arith.constant 0.000000e+00 : f32
    %cst_55 = arith.constant 6.000000e+00 : f32
    %211 = vector.broadcast %cst_54 : f32 to vector<68x68xf32>
    %212 = arith.maximumf %211, %210 : vector<68x68xf32>
    %213 = vector.broadcast %cst_55 : f32 to vector<68x68xf32>
    %214 = arith.minimumf %213, %212 : vector<68x68xf32>
    %215 = arith.mulf %208, %214 : vector<68x68xf32>
    %cst_56 = arith.constant 0.166666672 : f32
    %216 = vector.broadcast %cst_56 : f32 to vector<68x68xf32>
    %217 = arith.mulf %215, %216 : vector<68x68xf32>
    %218 = arith.index_cast %184 : i32 to index
    %219 = memref.load %arg4[%218] : memref<6xf32, #tpu.memory_space<smem>>
    %220 = vector.broadcast %219 : f32 to vector<68x68xf32>
    %221 = arith.select %14, %220, %217 : vector<68x68xi1>, vector<68x68xf32>
    %c0_57 = arith.constant 0 : index
    %c4 = arith.constant 4 : index
    %c0_58 = arith.constant 0 : index
    %c0_59 = arith.constant 0 : index
    %222 = vector.load %arg6[%c0_57, %c4, %c0_58, %c0_59] : memref<1x6x68x68xf32, #tpu.memory_space<vmem>>, vector<1x1x68x68xf32>
    %223 = vector.shape_cast %222 : vector<1x1x68x68xf32> to vector<68x68xf32>
    %224 = vector.shape_cast %221 : vector<68x68xf32> to vector<1x1x68x68xf32>
    tpu.vector_store %arg6[%c0_57, %c4, %c0_58, %c0_59], %224 {strides = array<i32>} : memref<1x6x68x68xf32, #tpu.memory_space<vmem>>, vector<1x1x68x68xf32>,
    %c6_i32_60 = arith.constant 6 : i32
    %225 = arith.muli %arg1, %c6_i32_60 : i32
    %c5_i32 = arith.constant 5 : i32
    %226 = arith.addi %225, %c5_i32 : i32
    %227 = arith.index_cast %226 : i32 to index
    %228 = memref.load %arg3[%227] : memref<6xf32, #tpu.memory_space<smem>>
    %c0_61 = arith.constant 0 : index
    %229 = arith.index_cast %226 : i32 to index
    %230 = memref.load %arg2[%c0_61, %229] : memref<3x6xf32, #tpu.memory_space<smem>>
    %231 = vector.extract_strided_slice %1 {offsets = [0, 0, 0], sizes = [1, 68, 68], strides = [1, 1, 1]} : vector<3x68x68xf32> to vector<1x68x68xf32>
    %232 = vector.shape_cast %231 : vector<1x68x68xf32> to vector<68x68xf32>
    %233 = vector.broadcast %230 : f32 to vector<68x68xf32>
    %234 = arith.mulf %233, %232 : vector<68x68xf32>
    %235 = vector.broadcast %228 : f32 to vector<68x68xf32>
    %236 = arith.addf %235, %234 : vector<68x68xf32>
    %c1_62 = arith.constant 1 : index
    %237 = arith.index_cast %226 : i32 to index
    %238 = memref.load %arg2[%c1_62, %237] : memref<3x6xf32, #tpu.memory_space<smem>>
    %239 = vector.extract_strided_slice %1 {offsets = [1, 0, 0], sizes = [1, 68, 68], strides = [1, 1, 1]} : vector<3x68x68xf32> to vector<1x68x68xf32>
    %240 = vector.shape_cast %239 : vector<1x68x68xf32> to vector<68x68xf32>
    %241 = vector.broadcast %238 : f32 to vector<68x68xf32>
    %242 = arith.mulf %241, %240 : vector<68x68xf32>
    %243 = arith.addf %236, %242 : vector<68x68xf32>
    %c2_63 = arith.constant 2 : index
    %244 = arith.index_cast %226 : i32 to index
    %245 = memref.load %arg2[%c2_63, %244] : memref<3x6xf32, #tpu.memory_space<smem>>
    %246 = vector.extract_strided_slice %1 {offsets = [2, 0, 0], sizes = [1, 68, 68], strides = [1, 1, 1]} : vector<3x68x68xf32> to vector<1x68x68xf32>
    %247 = vector.shape_cast %246 : vector<1x68x68xf32> to vector<68x68xf32>
    %248 = vector.broadcast %245 : f32 to vector<68x68xf32>
    %249 = arith.mulf %248, %247 : vector<68x68xf32>
    %250 = arith.addf %243, %249 : vector<68x68xf32>
    %cst_64 = arith.constant 3.000000e+00 : f32
    %251 = vector.broadcast %cst_64 : f32 to vector<68x68xf32>
    %252 = arith.addf %250, %251 : vector<68x68xf32>
    %cst_65 = arith.constant 0.000000e+00 : f32
    %cst_66 = arith.constant 6.000000e+00 : f32
    %253 = vector.broadcast %cst_65 : f32 to vector<68x68xf32>
    %254 = arith.maximumf %253, %252 : vector<68x68xf32>
    %255 = vector.broadcast %cst_66 : f32 to vector<68x68xf32>
    %256 = arith.minimumf %255, %254 : vector<68x68xf32>
    %257 = arith.mulf %250, %256 : vector<68x68xf32>
    %cst_67 = arith.constant 0.166666672 : f32
    %258 = vector.broadcast %cst_67 : f32 to vector<68x68xf32>
    %259 = arith.mulf %257, %258 : vector<68x68xf32>
    %260 = arith.index_cast %226 : i32 to index
    %261 = memref.load %arg4[%260] : memref<6xf32, #tpu.memory_space<smem>>
    %262 = vector.broadcast %261 : f32 to vector<68x68xf32>
    %263 = arith.select %14, %262, %259 : vector<68x68xi1>, vector<68x68xf32>
    %c0_68 = arith.constant 0 : index
    %c5 = arith.constant 5 : index
    %c0_69 = arith.constant 0 : index
    %c0_70 = arith.constant 0 : index
    %264 = vector.load %arg6[%c0_68, %c5, %c0_69, %c0_70] : memref<1x6x68x68xf32, #tpu.memory_space<vmem>>, vector<1x1x68x68xf32>
    %265 = vector.shape_cast %264 : vector<1x1x68x68xf32> to vector<68x68xf32>
    %266 = vector.shape_cast %263 : vector<68x68xf32> to vector<1x1x68x68xf32>
    tpu.vector_store %arg6[%c0_68, %c5, %c0_69, %c0_70], %266 {strides = array<i32>} : memref<1x6x68x68xf32, #tpu.memory_space<vmem>>, vector<1x1x68x68xf32>,
    return
  }
  func.func @transform_0(%arg0: i32, %arg1: i32) -> (i32, i32) {
    %c0_i32 = arith.constant 0 : i32
    %c0_i32_0 = arith.constant 0 : i32
    %c0_i32_1 = arith.constant 0 : i32
    return %c0_i32, %c0_i32_0 : i32, i32
  }
  func.func @transform_1(%arg0: i32, %arg1: i32) -> i32 {
    %c0_i32 = arith.constant 0 : i32
    %c0_i32_0 = arith.constant 0 : i32
    return %c0_i32 : i32
  }
  func.func @transform_2(%arg0: i32, %arg1: i32) -> i32 {
    %c0_i32 = arith.constant 0 : i32
    %c0_i32_0 = arith.constant 0 : i32
    return %c0_i32 : i32
  }
  func.func @transform_3(%arg0: i32, %arg1: i32) -> (i32, i32, i32, i32) {
    %c0_i32 = arith.constant 0 : i32
    %c0_i32_0 = arith.constant 0 : i32
    %c0_i32_1 = arith.constant 0 : i32
    %c0_i32_2 = arith.constant 0 : i32
    return %arg0, %c0_i32, %c0_i32_0, %c0_i32_1 : i32, i32, i32, i32
  }
  func.func @transform_4(%arg0: i32, %arg1: i32) -> (i32, i32, i32, i32) {
    %c0_i32 = arith.constant 0 : i32
    %c0_i32_0 = arith.constant 0 : i32
    %c0_i32_1 = arith.constant 0 : i32
    return %arg0, %arg1, %c0_i32, %c0_i32_0 : i32, i32, i32, i32
  }
}

</mosaic_0001>

<bundles_post_ra>
// kernel: model_forward.1
= control target key start
LH: loop header
LB: loop body
LE: loop exit
PB: predicated region body
PF: predicated region fallthrough
CT: control target
= control target key end

     0   :  { %9 = vsyncpa [#allocation3], 0  ;;  %s2365_s0 = inlined_call_operand.vmem [shape: f32[3,6], index: 0, kind: input, shape index: {}]   ;;  %s2366_s1 = inlined_call_operand.vmem [shape: f32[6], index: 1, kind: input, shape index: {}]   ;;  %s2367_s2 = inlined_call_operand.vmem [shape: f32[6], index: 2, kind: input, shape index: {}]   ;;  %s2368_s3 = inlined_call_operand.vmem [shape: f32[1,3,68,68], index: 3, kind: input, shape index: {}]   ;;  %s2369_s4 = inlined_call_operand.vmem [shape: f32[1,6,68,68], index: 4, kind: output, shape index: {}]  }
   0x1   :  { %10 = vsyncpa [#allocation5], 0  ;;  %s25_s17 = sshll.u32 %s2366_s1, 4  ;;  %s16_s20 = sshll.u32 %s2365_s0, 4  ;;  %s26_s17 = int_to_ptr.vmem [resolvable:$true] %s25_s17  ;;  %s17_s20 = int_to_ptr.vmem [resolvable:$true] %s16_s20 }
   0x2   :  { %s1122_s21 = smov [#allocation4]   ;;  %s1123_s22 = smov [#allocation2]  }
   0x3   :  { %28 = dma.vmem_to_smem %s26_s17, 16, %s1122_s21, [#allocation5]  }
   0x4   :  { %19 = dma.vmem_to_smem %s17_s20, 64, %s1123_s22, [#allocation3]  }
   0x5   :  { %s34_s25 = sshll.u32 %s2367_s2, 4  ;;  %s1124_s26 = smov [#allocation6]   ;;  %s35_s25 = int_to_ptr.vmem [resolvable:$true] %s34_s25 }
   0x6   :  { %37 = dma.vmem_to_smem %s35_s25, 16, %s1124_s26, [#allocation5]  }
   0x7   :  { %1118 = dma.done.wait [#allocation3], 64  }
   0x8   :  { %1119 = vsyncadd [#allocation3], 4294967232 }
   0x9   :  { %1120 = dma.done.wait [#allocation5], 32  }
   0xa   :  { %1121 = vsyncadd [#allocation5], 4294967264 }
   0xb   :  { %52 = sfence }
   0xc   :  { %v80_v0 = vlaneseq  ;;  %s140_s1 = sld [smem:[#allocation4]]  ;;  %v1166_v3 = vld [vmem:[%s2368_s3] sm:$0xff]  ;;  %v1171_v4 = vld [vmem:[%s2368_s3 + $0x8] sm:$0xff]  ;;  %v1176_v5 = vld [vmem:[%s2368_s3 + $0x10] sm:$0xff]  ;;  %vm268_vm3 = vcmask 556032   ;;  %vm277_vm8 = vcmask 551936  }
   0xd   :  { %s141_s0 = sld [smem:[#allocation2]]  ;;  %v1181_v6 = vld [vmem:[%s2368_s3 + $0x48] sm:$0xff]  ;;  %v1186_v7 = vld [vmem:[%s2368_s3 + $0x50] sm:$0xff]  ;;  %v1191_v8 = vld [vmem:[%s2368_s3 + $0x58] sm:$0xff] }
   0xe   :  { %s980_s27 = sld [smem:[#allocation2 + $0x80]]  ;;  %v1159_v1 = vshrl.u32 %v80_v0, 7  ;;  %v1161_v2 = vand.u32 127, %v80_v0  ;;  %v1196_v9 = vld [vmem:[%s2368_s3 + $0x90] sm:$0xff]  ;;  %v1214_v15 = vld [vmem:[%s2368_s3 + $0x98] sm:$0xff]  ;;  %v1221_v17 = vld [vmem:[%s2368_s3 + $0xa0] sm:$0xff] }
   0xf   :  { %s981_s28 = sld [smem:[#allocation2 + $0x100]]  ;;  %v1228_v19 = vld [vmem:[%s2368_s3 + $0x18] sm:$0xff]  ;;  %v1241_v24 = vld [vmem:[%s2368_s3 + $0x60] sm:$0xff]  ;;  %v1246_v25 = vld [vmem:[%s2368_s3 + $0xa8] sm:$0xff] }
  0x10   :  { %s257_s29 = sld [smem:[#allocation6]]  ;;  %v1203_v12 = vadd.s32 64, %v1159_v1  ;;  %vm92_vm0 = vcmp.eq.s32.totalorder %v1159_v1, 0  ;;  %vm119_vm1 = vcmp.eq.s32.totalorder %v1161_v2, 0  ;;  %v1257_v30 = vld [vmem:[%s2368_s3 + $0x20] sm:$0xff]  ;;  %v1262_v31 = vld [vmem:[%s2368_s3 + $0x68] sm:$0xff] }
  0x11   :  { %vm129_vm2 = vcmp.eq.s32.totalorder %v1161_v2, 67  ;;  %v1275_v36 = vld [vmem:[%s2368_s3 + $0xb0] sm:$0xff]  ;;  %v1280_v37 = vld [vmem:[%s2368_s3 + $0x28] sm:$0xff]  ;;  %v1299_v47 = vld [vmem:[%s2368_s3 + $0xb8] sm:$0xff]  ;;  %s1346_s18 = sld [smem:[#allocation4 + $0x1]] }
  0x12   :  { %v1200_v11 = vstv %s140_s1  ;;  %v1289_v42 = vld [vmem:[%s2368_s3 + $0x70] sm:$0xff]  ;;  %v1316_v57 = vld [vmem:[%s2368_s3 + $0x78] sm:$0xff]  ;;  %vm1334_vm4 = vmor %vm92_vm0, %vm119_vm1  ;;  %s1348_s19 = sld [smem:[#allocation2 + $0x1]]  ;;  %vm109_vm7 = vcmp.eq.s32.totalorder %v1203_v12, 67 }
  0x13   :  { %v1198_v10 = vstv %s141_s0  ;;  %v1308_v52 = vld [vmem:[%s2368_s3 + $0x30] sm:$0xff]  ;;  %vm1354_vm5 = vmor %vm1334_vm4, %vm129_vm2  ;;  %s1360_s20 = sld [smem:[#allocation2 + $0x81]] }
  0x14   :  { %v143_v13 = vmul.f32 %v1198_v10, %v1166_v3  ;;  %v1209_v14 = vstv %s980_s27  ;;  %v144_v16 = vmul.f32 %v1198_v10, %v1171_v4  ;;  %v145_v18 = vmul.f32 %v1198_v10, %v1176_v5  ;;  %vm1366_vm6 = vmor %vm119_vm1, %vm129_vm2  ;;  %s1375_s23 = sld [smem:[#allocation2 + $0x101]] }
  0x15   :  { %v171_v20 = vmul.f32 %v1209_v14, %v1181_v6  ;;  %v1232_v21 = vstv %s981_s28  ;;  %v172_v22 = vmul.f32 %v1209_v14, %v1186_v7  ;;  %v173_v23 = vmul.f32 %v1209_v14, %v1191_v8  ;;  %s1401_s28 = sld [smem:[#allocation6 + $0x1]]  ;;  %vm128_vm9 = vmor %vm109_vm7, %vm119_vm1 }
  0x16   :  { %v153_v26 = vadd.f32 %v1200_v11, %v143_v13  ;;  %v194_v27 = vmul.f32 %v1232_v21, %v1196_v9  ;;  %v1251_v28 = vstv %s257_s29  ;;  %v154_v29 = vadd.f32 %v1200_v11, %v144_v16  ;;  %v1324_v13 = vld [vmem:[%s2368_s3 + $0xc0] sm:$0xff]  ;;  %vm1521_vm10 = vmor %vm128_vm9, %vm129_vm2  ;;  %s1544_s22 = sld [smem:[#allocation4 + $0x2]] }
  0x17   :  { %v195_v32 = vmul.f32 %v1232_v21, %v1214_v15  ;;  %v155_v33 = vadd.f32 %v1200_v11, %v145_v18  ;;  %v196_v34 = vmul.f32 %v1232_v21, %v1221_v17  ;;  %v146_v35 = vmul.f32 %v1198_v10, %v1228_v19  ;;  %s1554_s24 = sld [smem:[#allocation2 + $0x82]] }
  0x18   :  { %v180_v38 = vadd.f32 %v171_v20, %v153_v26  ;;  %v181_v39 = vadd.f32 %v172_v22, %v154_v29  ;;  %v174_v40 = vmul.f32 %v1209_v14, %v1241_v24  ;;  %v197_v41 = vmul.f32 %v1232_v21, %v1246_v25  ;;  %s1564_s1 = sld [smem:[#allocation2 + $0x102]] }
  0x19   :  { %v182_v43 = vadd.f32 %v173_v23, %v155_v33  ;;  %v156_v44 = vadd.f32 %v1200_v11, %v146_v35  ;;  %v147_v45 = vmul.f32 %v1198_v10, %v1257_v30  ;;  %v175_v46 = vmul.f32 %v1209_v14, %v1262_v31  ;;  %s1569_s0 = sld [smem:[#allocation6 + $0x2]] }
  0x1a   :  { %v203_v48 = vadd.f32 %v194_v27, %v180_v38  ;;  %v204_v49 = vadd.f32 %v195_v32, %v181_v39  ;;  %v198_v50 = vmul.f32 %v1232_v21, %v1275_v36  ;;  %v148_v51 = vmul.f32 %v1198_v10, %v1280_v37  ;;  %s1695_s16 = sld [smem:[#allocation4 + $0x3]] }
  0x1b   :  { %v205_v53 = vadd.f32 %v196_v34, %v182_v43  ;;  %v183_v54 = vadd.f32 %v174_v40, %v156_v44  ;;  %v157_v55 = vadd.f32 %v1200_v11, %v147_v45  ;;  %v176_v56 = vmul.f32 %v1209_v14, %v1289_v42  ;;  %v1342_v34 = vld [vmem:[%s2368_s3 + $0x38] sm:$0xff]  ;;  %s1700_s17 = sld [smem:[#allocation2 + $0x3]] }
  0x1c   :  { %v212_v58 = vadd.f32 3.0, %v203_v48  ;;  %v213_v59 = vadd.f32 3.0, %v204_v49  ;;  %v158_v60 = vadd.f32 %v1200_v11, %v148_v51  ;;  %v199_v61 = vmul.f32 %v1232_v21, %v1299_v47  ;;  %s1718_s21 = sld [smem:[#allocation2 + $0x103]] }
  0x1d   :  { %v214_v62 = vadd.f32 3.0, %v205_v53  ;;  %v206_v63 = vadd.f32 %v197_v41, %v183_v54  ;;  %v184_v0 = vadd.f32 %v175_v46, %v157_v55  ;;  %v149_v16 = vmul.f32 %v1198_v10, %v1308_v52  ;;  %s1849_s10 = sld [smem:[#allocation4 + $0x4]] }
  0x1e   :  { %v221_v18 = vmax.f32 %v212_v58, 0.0  ;;  %v222_v20 = vmax.f32 %v213_v59, 0.0  ;;  %v185_v22 = vadd.f32 %v176_v56, %v158_v60  ;;  %v177_v23 = vmul.f32 %v1209_v14, %v1316_v57  ;;  %s1854_s11 = sld [smem:[#allocation2 + $0x4]] }
  0x1f   :  { %v223_v27 = vmax.f32 %v214_v62, 0.0  ;;  %v215_v29 = vadd.f32 3.0, %v206_v63  ;;  %v207_v32 = vadd.f32 %v198_v50, %v184_v0  ;;  %v159_v33 = vadd.f32 %v1200_v11, %v149_v16  ;;  %v1380_v0 = vld [vmem:[%s2368_s3 + $0xc8] sm:$0xff]  ;;  %s1862_s14 = sld [smem:[#allocation2 + $0x84]] }
  0x20   :  { %v230_v35 = vmin.f32 %v221_v18, 6.0  ;;  %v231_v38 = vmin.f32 %v222_v20, 6.0  ;;  %v208_v39 = vadd.f32 %v199_v61, %v185_v22  ;;  %v200_v1 = vmul.f32 %v1232_v21, %v1324_v13  ;;  %s1869_s15 = sld [smem:[#allocation2 + $0x104]] }
  0x21   :  { %v232_v40 = vmin.f32 %v223_v27, 6.0  ;;  %v224_v41 = vmax.f32 %v215_v29, 0.0  ;;  %v216_v43 = vadd.f32 3.0, %v207_v32  ;;  %v186_v44 = vadd.f32 %v177_v23, %v159_v33  ;;  %v1386_v23 = vld [vmem:[%s2368_s3 + $0x40] sm:$0xf]  ;;  %s2138_s26 = sld [smem:[#allocation2 + $0x105]] }
  0x22   :  { %v239_v46 = vmul.f32 %v230_v35, %v203_v48  ;;  %v240_v50 = vmul.f32 %v231_v38, %v204_v49  ;;  %v217_v51 = vadd.f32 3.0, %v208_v39  ;;  %v150_v54 = vmul.f32 %v1198_v10, %v1342_v34  ;;  %v1373_v48 = vld [vmem:[%s2368_s3 + $0x80] sm:$0xff]  ;;  %s2147_s27 = sld [smem:[#allocation6 + $0x5]] }
  0x23   :  { %v241_v56 = vmul.f32 %v232_v40, %v205_v53  ;;  %v233_v58 = vmin.f32 %v224_v41, 6.0  ;;  %v225_v59 = vmax.f32 %v216_v43, 0.0  ;;  %v209_v60 = vadd.f32 %v200_v1, %v186_v44  ;;  %v1413_v41 = vld [vmem:[%s2368_s3 + $0xd0] sm:$0xf] }
  0x24   :  { %v248_v49 = vmul.f32 0.16666667, %v239_v46  ;;  %v249_v61 = vmul.f32 0.16666667, %v240_v50  ;;  %v226_v62 = vmax.f32 %v217_v51, 0.0  ;;  %v160_v53 = vadd.f32 %v1200_v11, %v150_v54 }
  0x25   :  { %v250_v16 = vmul.f32 0.16666667, %v241_v56  ;;  %v242_v18 = vmul.f32 %v233_v58, %v206_v63  ;;  %v234_v20 = vmin.f32 %v225_v59, 6.0  ;;  %v218_v22 = vadd.f32 3.0, %v209_v60  ;;  %v1399_v63 = vld [vmem:[%s2368_s3 + $0x88] sm:$0xf] }
  0x26   :  { %v259_v26 = vsel %vm1354_vm5, %v1251_v28, %v248_v49  ;;  %v260_v27 = vsel %vm1366_vm6, %v1251_v28, %v249_v61  ;;  %v235_v29 = vmin.f32 %v226_v62, 6.0  ;;  %v178_v33 = vmul.f32 %v1209_v14, %v1373_v48 }
  0x27   :  { %269 = vst.msk [vmem:[%s2369_s4] sm:$0xff] %vm268_vm3, %v259_v26  ;;  %v261_v35 = vsel %vm1366_vm6, %v1251_v28, %v250_v16  ;;  %v251_v38 = vmul.f32 0.16666667, %v242_v18  ;;  %v243_v1 = vmul.f32 %v234_v20, %v207_v32  ;;  %v227_v40 = vmax.f32 %v218_v22, 0.0 }
  0x28   :  { %270 = vst.msk [vmem:[%s2369_s4 + $0x8] sm:$0xff] %vm268_vm3, %v260_v27  ;;  %v244_v43 = vmul.f32 %v235_v29, %v208_v39  ;;  %v187_v44 = vadd.f32 %v178_v33, %v160_v53  ;;  %v201_v46 = vmul.f32 %v1232_v21, %v1380_v0  ;;  %v151_v32 = vmul.f32 %v1198_v10, %v1386_v23 }
  0x29   :  { %271 = vst.msk [vmem:[%s2369_s4 + $0x10] sm:$0xff] %vm268_vm3, %v261_v35  ;;  %v262_v50 = vsel %vm1366_vm6, %v1251_v28, %v251_v38  ;;  %v252_v51 = vmul.f32 0.16666667, %v243_v1  ;;  %v236_v54 = vmin.f32 %v227_v40, 6.0  ;;  %v179_v39 = vmul.f32 %v1209_v14, %v1399_v63 }
  0x2a   :  { %272 = vst.msk [vmem:[%s2369_s4 + $0x18] sm:$0xff] %vm268_vm3, %v262_v50  ;;  %v253_v10 = vmul.f32 0.16666667, %v244_v43  ;;  %v210_v56 = vadd.f32 %v201_v46, %v187_v44  ;;  %v161_v58 = vadd.f32 %v1200_v11, %v151_v32  ;;  %v202_v59 = vmul.f32 %v1232_v21, %v1413_v41 }
  0x2b   :  { %v263_v49 = vsel %vm1366_vm6, %v1251_v28, %v252_v51  ;;  %v245_v14 = vmul.f32 %v236_v54, %v209_v60  ;;  %v1444_v61 = vstv %s1348_s19  ;;  %v1460_v16 = vstv %s1346_s18  ;;  %s1705_s18 = sld [smem:[#allocation2 + $0x83]] }
  0x2c   :  { %273 = vst.msk [vmem:[%s2369_s4 + $0x20] sm:$0xff] %vm268_vm3, %v263_v49  ;;  %v264_v11 = vsel %vm1366_vm6, %v1251_v28, %v253_v10  ;;  %v219_v21 = vadd.f32 3.0, %v210_v56  ;;  %v188_v62 = vadd.f32 %v179_v39, %v161_v58  ;;  %v283_v53 = vmul.f32 %v1444_v61, %v1166_v3 }
  0x2d   :  { %274 = vst.msk [vmem:[%s2369_s4 + $0x28] sm:$0xff] %vm268_vm3, %v264_v11  ;;  %v254_v60 = vmul.f32 0.16666667, %v245_v14  ;;  %v1463_v18 = vstv %s1360_s20  ;;  %v1466_v20 = vstv %s1375_s23  ;;  %v1477_v38 = vstv %s1401_s28  ;;  %s1546_s23 = sld [smem:[#allocation2 + $0x2]] }
  0x2e   :  { %v228_v22 = vmax.f32 %v219_v21, 0.0  ;;  %v211_v26 = vadd.f32 %v202_v59, %v188_v62  ;;  %v293_v27 = vadd.f32 %v1460_v16, %v283_v53  ;;  %v311_v29 = vmul.f32 %v1463_v18, %v1181_v6 }
  0x2f   :  { %v265_v33 = vsel %vm1366_vm6, %v1251_v28, %v254_v60  ;;  %v334_v35 = vmul.f32 %v1466_v20, %v1196_v9  ;;  %v284_v1 = vmul.f32 %v1444_v61, %v1171_v4  ;;  %v312_v46 = vmul.f32 %v1463_v18, %v1186_v7 }
  0x30   :  { %275 = vst.msk [vmem:[%s2369_s4 + $0x30] sm:$0xff] %vm268_vm3, %v265_v33  ;;  %v237_v40 = vmin.f32 %v228_v22, 6.0  ;;  %v220_v43 = vadd.f32 3.0, %v211_v26  ;;  %v320_v44 = vadd.f32 %v311_v29, %v293_v27  ;;  %v335_v50 = vmul.f32 %v1466_v20, %v1214_v15 }
  0x31   :  { %v294_v32 = vadd.f32 %v1460_v16, %v284_v1  ;;  %v285_v51 = vmul.f32 %v1444_v61, %v1176_v5  ;;  %v313_v54 = vmul.f32 %v1463_v18, %v1191_v8  ;;  %v336_v59 = vmul.f32 %v1466_v20, %v1221_v17 }
  0x32   :  { %v246_v39 = vmul.f32 %v237_v40, %v210_v56  ;;  %v229_v10 = vmax.f32 %v220_v43, 0.0  ;;  %v343_v58 = vadd.f32 %v334_v35, %v320_v44  ;;  %v286_v11 = vmul.f32 %v1444_v61, %v1228_v19 }
  0x33   :  { %v321_v49 = vadd.f32 %v312_v46, %v294_v32  ;;  %v295_v14 = vadd.f32 %v1460_v16, %v285_v51  ;;  %v314_v21 = vmul.f32 %v1463_v18, %v1241_v24  ;;  %v337_v60 = vmul.f32 %v1466_v20, %v1246_v25 }
  0x34   :  { %v255_v62 = vmul.f32 0.16666667, %v246_v39  ;;  %v238_v56 = vmin.f32 %v229_v10, 6.0  ;;  %v352_v53 = vadd.f32 3.0, %v343_v58  ;;  %v296_v29 = vadd.f32 %v1460_v16, %v286_v11 }
  0x35   :  { %v344_v22 = vadd.f32 %v335_v50, %v321_v49  ;;  %v322_v27 = vadd.f32 %v313_v54, %v295_v14  ;;  %v287_v33 = vmul.f32 %v1444_v61, %v1257_v30  ;;  %v315_v12 = vmul.f32 %v1463_v18, %v1262_v31 }
  0x36   :  { %v266_v35 = vsel %vm1366_vm6, %v1251_v28, %v255_v62  ;;  %v247_v1 = vmul.f32 %v238_v56, %v211_v26  ;;  %v361_v40 = vmax.f32 %v352_v53, 0.0  ;;  %v323_v32 = vadd.f32 %v314_v21, %v296_v29 }
  0x37   :  { %276 = vst.msk [vmem:[%s2369_s4 + $0x38] sm:$0xff] %vm268_vm3, %v266_v35  ;;  %v353_v44 = vadd.f32 3.0, %v344_v22  ;;  %v345_v46 = vadd.f32 %v336_v59, %v322_v27  ;;  %v297_v26 = vadd.f32 %v1460_v16, %v287_v33  ;;  %v338_v54 = vmul.f32 %v1466_v20, %v1275_v36 }
  0x38   :  { %v256_v50 = vmul.f32 0.16666667, %v247_v1  ;;  %v370_v51 = vmin.f32 %v361_v40, 6.0  ;;  %v288_v39 = vmul.f32 %v1444_v61, %v1280_v37  ;;  %v346_v2 = vadd.f32 %v337_v60, %v323_v32 }
  0x39   :  { %v362_v10 = vmax.f32 %v353_v44, 0.0  ;;  %v354_v49 = vadd.f32 3.0, %v345_v46  ;;  %v324_v14 = vadd.f32 %v315_v12, %v297_v26  ;;  %v316_v62 = vmul.f32 %v1463_v18, %v1289_v42 }
  0x3a   :  { %v267_v11 = vsel %vm1521_vm10, %v1251_v28, %v256_v50  ;;  %v379_v59 = vmul.f32 %v370_v51, %v343_v58  ;;  %v298_v21 = vadd.f32 %v1460_v16, %v288_v39  ;;  %v355_v27 = vadd.f32 3.0, %v346_v2 }
  0x3b   :  { %278 = vst.msk [vmem:[%s2369_s4 + $0x40] sm:$0xf] %vm277_vm8, %v267_v11  ;;  %v371_v56 = vmin.f32 %v362_v10, 6.0  ;;  %v363_v53 = vmax.f32 %v354_v49, 0.0  ;;  %v347_v60 = vadd.f32 %v338_v54, %v324_v14  ;;  %v339_v28 = vmul.f32 %v1466_v20, %v1299_v47 }
  0x3c   :  { %v388_v29 = vmul.f32 0.16666667, %v379_v59  ;;  %v325_v33 = vadd.f32 %v316_v62, %v298_v21  ;;  %v289_v58 = vmul.f32 %v1444_v61, %v1308_v52  ;;  %v364_v40 = vmax.f32 %v355_v27, 0.0 }
  0x3d   :  { %v380_v35 = vmul.f32 %v371_v56, %v344_v22  ;;  %v372_v1 = vmin.f32 %v363_v53, 6.0  ;;  %v356_v12 = vadd.f32 3.0, %v347_v60  ;;  %v317_v50 = vmul.f32 %v1463_v18, %v1316_v57 }
  0x3e   :  { %v399_v44 = vsel %vm1354_vm5, %v1477_v38, %v388_v29  ;;  %v348_v32 = vadd.f32 %v339_v28, %v325_v33  ;;  %v299_v26 = vadd.f32 %v1460_v16, %v289_v58  ;;  %v373_v54 = vmin.f32 %v364_v40, 6.0 }
  0x3f   :  { %987 = vst.msk [vmem:[%s2369_s4 + $0x48] sm:$0xff] %vm268_vm3, %v399_v44  ;;  %v389_v22 = vmul.f32 0.16666667, %v380_v35  ;;  %v381_v51 = vmul.f32 %v372_v1, %v345_v46  ;;  %v365_v39 = vmax.f32 %v356_v12, 0.0  ;;  %v340_v14 = vmul.f32 %v1466_v20, %v1324_v13 }
  0x40   :  { %v357_v10 = vadd.f32 3.0, %v348_v32  ;;  %v326_v49 = vadd.f32 %v317_v50, %v299_v26  ;;  %v290_v11 = vmul.f32 %v1444_v61, %v1342_v34  ;;  %v382_v62 = vmul.f32 %v373_v54, %v346_v2 }
  0x41   :  { %v400_v59 = vsel %vm1366_vm6, %v1477_v38, %v389_v22  ;;  %v390_v21 = vmul.f32 0.16666667, %v381_v51  ;;  %v374_v56 = vmin.f32 %v365_v39, 6.0  ;;  %v318_v29 = vmul.f32 %v1463_v18, %v1373_v48 }
  0x42   :  { %988 = vst.msk [vmem:[%s2369_s4 + $0x50] sm:$0xff] %vm268_vm3, %v400_v59  ;;  %v366_v46 = vmax.f32 %v357_v10, 0.0  ;;  %v349_v53 = vadd.f32 %v340_v14, %v326_v49  ;;  %v300_v27 = vadd.f32 %v1460_v16, %v290_v11  ;;  %v391_v2 = vmul.f32 0.16666667, %v382_v62 }
  0x43   :  { %v401_v33 = vsel %vm1366_vm6, %v1477_v38, %v390_v21  ;;  %v383_v28 = vmul.f32 %v374_v56, %v347_v60  ;;  %v341_v58 = vmul.f32 %v1466_v20, %v1380_v0  ;;  %v291_v12 = vmul.f32 %v1444_v61, %v1386_v23 }
  0x44   :  { %989 = vst.msk [vmem:[%s2369_s4 + $0x58] sm:$0xff] %vm268_vm3, %v401_v33  ;;  %v375_v35 = vmin.f32 %v366_v46, 6.0  ;;  %v358_v1 = vadd.f32 3.0, %v349_v53  ;;  %v327_v40 = vadd.f32 %v318_v29, %v300_v27  ;;  %v402_v60 = vsel %vm1366_vm6, %v1477_v38, %v391_v2 }
  0x45   :  { %v392_v44 = vmul.f32 0.16666667, %v383_v28  ;;  %v319_v26 = vmul.f32 %v1463_v18, %v1399_v63  ;;  %v342_v50 = vmul.f32 %v1466_v20, %v1413_v41  ;;  %990 = vst.msk [vmem:[%s2369_s4 + $0x60] sm:$0xff] %vm268_vm3, %v402_v60  ;;  %v301_v54 = vadd.f32 %v1460_v16, %v291_v12 }
  0x46   :  { %v384_v22 = vmul.f32 %v375_v35, %v348_v32  ;;  %v367_v61 = vmax.f32 %v358_v1, 0.0  ;;  %v350_v51 = vadd.f32 %v341_v58, %v327_v40  ;;  %v1605_v18 = vstv %s1546_s23  ;;  %s2125_s23 = sld [smem:[#allocation2 + $0x85]] }
  0x47   :  { %v403_v39 = vsel %vm1366_vm6, %v1477_v38, %v392_v44  ;;  %v1608_v10 = vstv %s1544_s22  ;;  %v1611_v20 = vstv %s1554_s24  ;;  %v328_v11 = vadd.f32 %v319_v26, %v301_v54  ;;  %s1732_s24 = sld [smem:[#allocation6 + $0x3]] }
  0x48   :  { %991 = vst.msk [vmem:[%s2369_s4 + $0x68] sm:$0xff] %vm268_vm3, %v403_v39  ;;  %v393_v32 = vmul.f32 0.16666667, %v384_v22  ;;  %v376_v49 = vmin.f32 %v367_v61, 6.0  ;;  %v359_v14 = vadd.f32 3.0, %v350_v51  ;;  %v422_v16 = vmul.f32 %v1605_v18, %v1166_v3  ;;  %s2123_s22 = sld [smem:[#allocation4 + $0x5]] }
  0x49   :  { %v450_v59 = vmul.f32 %v1611_v20, %v1181_v6  ;;  %v1622_v21 = vstv %s1564_s1  ;;  %v1625_v62 = vstv %s1569_s0  ;;  %v351_v29 = vadd.f32 %v342_v50, %v328_v11 }
  0x4a   :  { %v404_v56 = vsel %vm1366_vm6, %v1477_v38, %v393_v32  ;;  %v385_v46 = vmul.f32 %v376_v49, %v349_v53  ;;  %v368_v27 = vmax.f32 %v359_v14, 0.0  ;;  %v432_v33 = vadd.f32 %v1608_v10, %v422_v16 }
  0x4b   :  { %992 = vst.msk [vmem:[%s2369_s4 + $0x70] sm:$0xff] %vm268_vm3, %v404_v56  ;;  %v473_v2 = vmul.f32 %v1622_v21, %v1196_v9  ;;  %v423_v28 = vmul.f32 %v1605_v18, %v1171_v4  ;;  %v451_v58 = vmul.f32 %v1611_v20, %v1186_v7  ;;  %v360_v1 = vadd.f32 3.0, %v351_v29 }
  0x4c   :  { %v394_v35 = vmul.f32 0.16666667, %v385_v46  ;;  %v377_v53 = vmin.f32 %v368_v27, 6.0  ;;  %v474_v40 = vmul.f32 %v1622_v21, %v1214_v15  ;;  %v459_v12 = vadd.f32 %v450_v59, %v432_v33 }
  0x4d   :  { %v433_v60 = vadd.f32 %v1608_v10, %v423_v28  ;;  %v424_v44 = vmul.f32 %v1605_v18, %v1176_v5  ;;  %v452_v26 = vmul.f32 %v1611_v20, %v1191_v8  ;;  %v369_v61 = vmax.f32 %v360_v1, 0.0 }
  0x4e   :  { %v405_v50 = vsel %vm1366_vm6, %v1477_v38, %v394_v35  ;;  %v386_v22 = vmul.f32 %v377_v53, %v350_v51  ;;  %v475_v54 = vmul.f32 %v1622_v21, %v1221_v17  ;;  %v482_v39 = vadd.f32 %v473_v2, %v459_v12 }
  0x4f   :  { %993 = vst.msk [vmem:[%s2369_s4 + $0x78] sm:$0xff] %vm268_vm3, %v405_v50  ;;  %v460_v32 = vadd.f32 %v451_v58, %v433_v60  ;;  %v434_v49 = vadd.f32 %v1608_v10, %v424_v44  ;;  %v425_v14 = vmul.f32 %v1605_v18, %v1228_v19  ;;  %v378_v16 = vmin.f32 %v369_v61, 6.0 }
  0x50   :  { %v395_v11 = vmul.f32 0.16666667, %v386_v22  ;;  %v453_v51 = vmul.f32 %v1611_v20, %v1241_v24  ;;  %v476_v59 = vmul.f32 %v1622_v21, %v1246_v25  ;;  %v491_v56 = vadd.f32 3.0, %v482_v39 }
  0x51   :  { %v483_v46 = vadd.f32 %v474_v40, %v460_v32  ;;  %v461_v27 = vadd.f32 %v452_v26, %v434_v49  ;;  %v435_v33 = vadd.f32 %v1608_v10, %v425_v14  ;;  %v387_v28 = vmul.f32 %v378_v16, %v351_v29 }
  0x52   :  { %v406_v2 = vsel %vm1366_vm6, %v1477_v38, %v395_v11  ;;  %v426_v58 = vmul.f32 %v1605_v18, %v1257_v30  ;;  %v454_v35 = vmul.f32 %v1611_v20, %v1262_v31  ;;  %v500_v53 = vmax.f32 %v491_v56, 0.0 }
  0x53   :  { %994 = vst.msk [vmem:[%s2369_s4 + $0x80] sm:$0xff] %vm268_vm3, %v406_v2  ;;  %v492_v1 = vadd.f32 3.0, %v483_v46  ;;  %v484_v40 = vadd.f32 %v475_v54, %v461_v27  ;;  %v462_v12 = vadd.f32 %v453_v51, %v435_v33  ;;  %v396_v60 = vmul.f32 0.16666667, %v387_v28 }
  0x54   :  { %v436_v44 = vadd.f32 %v1608_v10, %v426_v58  ;;  %v477_v29 = vmul.f32 %v1622_v21, %v1275_v36  ;;  %v427_v26 = vmul.f32 %v1605_v18, %v1280_v37  ;;  %v509_v50 = vmin.f32 %v500_v53, 6.0 }
  0x55   :  { %v501_v22 = vmax.f32 %v492_v1, 0.0  ;;  %v493_v61 = vadd.f32 3.0, %v484_v40  ;;  %v485_v32 = vadd.f32 %v476_v59, %v462_v12  ;;  %v407_v49 = vsel %vm1521_vm10, %v1477_v38, %v396_v60 }
  0x56   :  { %v463_v14 = vadd.f32 %v454_v35, %v436_v44  ;;  %v437_v54 = vadd.f32 %v1608_v10, %v427_v26  ;;  %v455_v11 = vmul.f32 %v1611_v20, %v1289_v42  ;;  %995 = vst.msk [vmem:[%s2369_s4 + $0x88] sm:$0xf] %vm277_vm8, %v407_v49  ;;  %v518_v16 = vmul.f32 %v509_v50, %v482_v39 }
  0x57   :  { %v510_v51 = vmin.f32 %v501_v22, 6.0  ;;  %v502_v56 = vmax.f32 %v493_v61, 0.0  ;;  %v494_v27 = vadd.f32 3.0, %v485_v32  ;;  %v478_v38 = vmul.f32 %v1622_v21, %v1299_v47 }
  0x58   :  { %v486_v59 = vadd.f32 %v477_v29, %v463_v14  ;;  %v464_v33 = vadd.f32 %v455_v11, %v437_v54  ;;  %v428_v2 = vmul.f32 %v1605_v18, %v1308_v52  ;;  %v527_v28 = vmul.f32 0.16666667, %v518_v16 }
  0x59   :  { %v519_v58 = vmul.f32 %v510_v51, %v483_v46  ;;  %v511_v35 = vmin.f32 %v502_v56, 6.0  ;;  %v503_v53 = vmax.f32 %v494_v27, 0.0  ;;  %v456_v60 = vmul.f32 %v1611_v20, %v1316_v57 }
  0x5a   :  { %v495_v1 = vadd.f32 3.0, %v486_v59  ;;  %v487_v12 = vadd.f32 %v478_v38, %v464_v33  ;;  %v438_v39 = vadd.f32 %v1608_v10, %v428_v2  ;;  %v538_v44 = vsel %vm1354_vm5, %v1625_v62, %v527_v28 }
  0x5b   :  { %v528_v29 = vmul.f32 0.16666667, %v519_v58  ;;  %v520_v26 = vmul.f32 %v511_v35, %v484_v40  ;;  %v512_v46 = vmin.f32 %v503_v53, 6.0  ;;  %1001 = vst.msk [vmem:[%s2369_s4 + $0x90] sm:$0xff] %vm268_vm3, %v538_v44  ;;  %v479_v49 = vmul.f32 %v1622_v21, %v1324_v13 }
  0x5c   :  { %v504_v50 = vmax.f32 %v495_v1, 0.0  ;;  %v496_v22 = vadd.f32 3.0, %v487_v12  ;;  %v465_v61 = vadd.f32 %v456_v60, %v438_v39  ;;  %v429_v11 = vmul.f32 %v1605_v18, %v1342_v34 }
  0x5d   :  { %v539_v14 = vsel %vm1366_vm6, %v1625_v62, %v528_v29  ;;  %v529_v54 = vmul.f32 0.16666667, %v520_v26  ;;  %v521_v40 = vmul.f32 %v512_v46, %v485_v32  ;;  %v457_v27 = vmul.f32 %v1611_v20, %v1373_v48 }
  0x5e   :  { %1002 = vst.msk [vmem:[%s2369_s4 + $0x98] sm:$0xff] %vm268_vm3, %v539_v14  ;;  %v513_v16 = vmin.f32 %v504_v50, 6.0  ;;  %v505_v51 = vmax.f32 %v496_v22, 0.0  ;;  %v488_v56 = vadd.f32 %v479_v49, %v465_v61  ;;  %v439_v38 = vadd.f32 %v1608_v10, %v429_v11 }
  0x5f   :  { %v540_v32 = vsel %vm1366_vm6, %v1625_v62, %v529_v54  ;;  %v530_v33 = vmul.f32 0.16666667, %v521_v40  ;;  %v480_v2 = vmul.f32 %v1622_v21, %v1380_v0  ;;  %v430_v53 = vmul.f32 %v1605_v18, %v1386_v23 }
  0x60   :  { %1003 = vst.msk [vmem:[%s2369_s4 + $0xa0] sm:$0xff] %vm268_vm3, %v540_v32  ;;  %v522_v28 = vmul.f32 %v513_v16, %v486_v59  ;;  %v514_v58 = vmin.f32 %v505_v51, 6.0  ;;  %v497_v35 = vadd.f32 3.0, %v488_v56  ;;  %v466_v39 = vadd.f32 %v457_v27, %v439_v38 }
  0x61   :  { %v541_v1 = vsel %vm1366_vm6, %v1625_v62, %v530_v33  ;;  %v458_v60 = vmul.f32 %v1611_v20, %v1399_v63  ;;  %v481_v44 = vmul.f32 %v1622_v21, %v1413_v41  ;;  %v440_v26 = vadd.f32 %v1608_v10, %v430_v53 }
  0x62   :  { %1004 = vst.msk [vmem:[%s2369_s4 + $0xa8] sm:$0xff] %vm268_vm3, %v541_v1  ;;  %v531_v59 = vmul.f32 0.16666667, %v522_v28  ;;  %v523_v29 = vmul.f32 %v514_v58, %v487_v12  ;;  %v506_v18 = vmax.f32 %v497_v35, 0.0  ;;  %v489_v46 = vadd.f32 %v480_v2, %v466_v39 }
  0x63   :  { %v1753_v50 = vstv %s1700_s17  ;;  %v1756_v22 = vstv %s1695_s16  ;;  %v1759_v20 = vstv %s1705_s18  ;;  %v467_v14 = vadd.f32 %v458_v60, %v440_v26  ;;  %s1883_s18 = sld [smem:[#allocation6 + $0x4]] }
  0x64   :  { %v542_v21 = vsel %vm1366_vm6, %v1625_v62, %v531_v59  ;;  %v532_v61 = vmul.f32 0.16666667, %v523_v29  ;;  %v515_v49 = vmin.f32 %v506_v18, 6.0  ;;  %v498_v10 = vadd.f32 3.0, %v489_v46  ;;  %s2107_s17 = sld [smem:[#allocation2 + $0x5]] }
  0x65   :  { %1005 = vst.msk [vmem:[%s2369_s4 + $0xb0] sm:$0xff] %vm268_vm3, %v542_v21  ;;  %v561_v12 = vmul.f32 %v1753_v50, %v1166_v3  ;;  %v589_v54 = vmul.f32 %v1759_v20, %v1181_v6  ;;  %v1773_v40 = vstv %s1718_s21  ;;  %v490_v51 = vadd.f32 %v481_v44, %v467_v14 }
  0x66   :  { %v543_v11 = vsel %vm1366_vm6, %v1625_v62, %v532_v61  ;;  %v524_v16 = vmul.f32 %v515_v49, %v488_v56  ;;  %v612_v27 = vmul.f32 %v1773_v40, %v1196_v9  ;;  %v507_v3 = vmax.f32 %v498_v10, 0.0 }
  0x67   :  { %1006 = vst.msk [vmem:[%s2369_s4 + $0xb8] sm:$0xff] %vm268_vm3, %v543_v11  ;;  %v571_v32 = vadd.f32 %v1756_v22, %v561_v12  ;;  %v1786_v6 = vstv %s1732_s24  ;;  %v562_v33 = vmul.f32 %v1753_v50, %v1171_v4  ;;  %v499_v2 = vadd.f32 3.0, %v490_v51 }
  0x68   :  { %v533_v38 = vmul.f32 0.16666667, %v524_v16  ;;  %v590_v56 = vmul.f32 %v1759_v20, %v1186_v7  ;;  %v613_v9 = vmul.f32 %v1773_v40, %v1214_v15  ;;  %v516_v28 = vmin.f32 %v507_v3, 6.0 }
  0x69   :  { %v598_v58 = vadd.f32 %v589_v54, %v571_v32  ;;  %v572_v35 = vadd.f32 %v1756_v22, %v562_v33  ;;  %v563_v53 = vmul.f32 %v1753_v50, %v1176_v5  ;;  %v508_v4 = vmax.f32 %v499_v2, 0.0 }
  0x6a   :  { %v544_v1 = vsel %vm1366_vm6, %v1625_v62, %v533_v38  ;;  %v591_v39 = vmul.f32 %v1759_v20, %v1191_v8  ;;  %v614_v7 = vmul.f32 %v1773_v40, %v1221_v17  ;;  %v525_v15 = vmul.f32 %v516_v28, %v489_v46 }
  0x6b   :  { %1007 = vst.msk [vmem:[%s2369_s4 + $0xc0] sm:$0xff] %vm268_vm3, %v544_v1  ;;  %v621_v60 = vadd.f32 %v612_v27, %v598_v58  ;;  %v599_v44 = vadd.f32 %v590_v56, %v572_v35  ;;  %v573_v5 = vadd.f32 %v1756_v22, %v563_v53  ;;  %v517_v59 = vmin.f32 %v508_v4, 6.0 }
  0x6c   :  { %v564_v29 = vmul.f32 %v1753_v50, %v1228_v19  ;;  %v592_v8 = vmul.f32 %v1759_v20, %v1241_v24  ;;  %v615_v17 = vmul.f32 %v1773_v40, %v1246_v25  ;;  %v534_v18 = vmul.f32 0.16666667, %v525_v15 }
  0x6d   :  { %v630_v26 = vadd.f32 3.0, %v621_v60  ;;  %v622_v21 = vadd.f32 %v613_v9, %v599_v44  ;;  %v600_v61 = vadd.f32 %v591_v39, %v573_v5  ;;  %v526_v49 = vmul.f32 %v517_v59, %v490_v51 }
  0x6e   :  { %v574_v46 = vadd.f32 %v1756_v22, %v564_v29  ;;  %v565_v14 = vmul.f32 %v1753_v50, %v1257_v30  ;;  %v593_v10 = vmul.f32 %v1759_v20, %v1262_v31  ;;  %v545_v19 = vsel %vm1366_vm6, %v1625_v62, %v534_v18 }
  0x6f   :  { %v639_v24 = vmax.f32 %v630_v26, 0.0  ;;  %v631_v12 = vadd.f32 3.0, %v622_v21  ;;  %v623_v25 = vadd.f32 %v614_v7, %v600_v61  ;;  %1008 = vst.msk [vmem:[%s2369_s4 + $0xc8] sm:$0xff] %vm268_vm3, %v545_v19  ;;  %v535_v54 = vmul.f32 0.16666667, %v526_v49 }
  0x70   :  { %v601_v11 = vadd.f32 %v592_v8, %v574_v46  ;;  %v575_v16 = vadd.f32 %v1756_v22, %v565_v14  ;;  %v616_v30 = vmul.f32 %v1773_v40, %v1275_v36  ;;  %v566_v3 = vmul.f32 %v1753_v50, %v1280_v37 }
  0x71   :  { %v648_v31 = vmin.f32 %v639_v24, 6.0  ;;  %v640_v51 = vmax.f32 %v631_v12, 0.0  ;;  %v632_v27 = vadd.f32 3.0, %v623_v25  ;;  %v546_v32 = vsel %vm1521_vm10, %v1625_v62, %v535_v54 }
  0x72   :  { %v624_v33 = vadd.f32 %v615_v17, %v601_v11  ;;  %v602_v38 = vadd.f32 %v593_v10, %v575_v16  ;;  %v594_v2 = vmul.f32 %v1759_v20, %v1289_v42  ;;  %1009 = vst.msk [vmem:[%s2369_s4 + $0xd0] sm:$0xf] %vm277_vm8, %v546_v32  ;;  %v576_v28 = vadd.f32 %v1756_v22, %v566_v3 }
  0x73   :  { %v657_v36 = vmul.f32 %v648_v31, %v621_v60  ;;  %v649_v56 = vmin.f32 %v640_v51, 6.0  ;;  %v641_v9 = vmax.f32 %v632_v27, 0.0  ;;  %v617_v62 = vmul.f32 %v1773_v40, %v1299_v47 }
  0x74   :  { %v633_v37 = vadd.f32 3.0, %v624_v33  ;;  %v625_v58 = vadd.f32 %v616_v30, %v602_v38  ;;  %v567_v35 = vmul.f32 %v1753_v50, %v1308_v52  ;;  %v603_v4 = vadd.f32 %v594_v2, %v576_v28 }
  0x75   :  { %v666_v53 = vmul.f32 0.16666667, %v657_v36  ;;  %v658_v42 = vmul.f32 %v649_v56, %v622_v21  ;;  %v650_v1 = vmin.f32 %v641_v9, 6.0  ;;  %v595_v60 = vmul.f32 %v1759_v20, %v1316_v57 }
  0x76   :  { %v642_v39 = vmax.f32 %v633_v37, 0.0  ;;  %v634_v7 = vadd.f32 3.0, %v625_v58  ;;  %v577_v15 = vadd.f32 %v1756_v22, %v567_v35  ;;  %v626_v52 = vadd.f32 %v617_v62, %v603_v4  ;;  %v1933_v37 = vld [vmem:[%s2368_s3 + $0x48] sm:$0xff] }
  0x77   :  { %v677_v47 = vsel %vm1354_vm5, %v1786_v6, %v666_v53  ;;  %v667_v44 = vmul.f32 0.16666667, %v658_v42  ;;  %v659_v5 = vmul.f32 %v650_v1, %v623_v25  ;;  %v618_v57 = vmul.f32 %v1773_v40, %v1324_v13  ;;  %v1943_v53 = vld [vmem:[%s2368_s3 + $0x90] sm:$0xff] }
  0x78   :  { %1015 = vst.msk [vmem:[%s2369_s4 + $0xd8] sm:$0xff] %vm268_vm3, %v677_v47  ;;  %v651_v59 = vmin.f32 %v642_v39, 6.0  ;;  %v643_v29 = vmax.f32 %v634_v7, 0.0  ;;  %v604_v8 = vadd.f32 %v595_v60, %v577_v15  ;;  %v635_v26 = vadd.f32 3.0, %v626_v52  ;;  %v1957_v15 = vld [vmem:[%s2368_s3 + $0x8] sm:$0xff] }
  0x79   :  { %v678_v17 = vsel %vm1366_vm6, %v1786_v6, %v667_v44  ;;  %v668_v18 = vmul.f32 0.16666667, %v659_v5  ;;  %v568_v21 = vmul.f32 %v1753_v50, %v1342_v34  ;;  %v596_v46 = vmul.f32 %v1759_v20, %v1373_v48  ;;  %v1964_v44 = vld [vmem:[%s2368_s3 + $0x50] sm:$0xff] }
  0x7a   :  { %1016 = vst.msk [vmem:[%s2369_s4 + $0xe0] sm:$0xff] %vm268_vm3, %v678_v17  ;;  %v660_v61 = vmul.f32 %v651_v59, %v624_v33  ;;  %v652_v13 = vmin.f32 %v643_v29, 6.0  ;;  %v627_v49 = vadd.f32 %v618_v57, %v604_v8  ;;  %v644_v10 = vmax.f32 %v635_v26, 0.0  ;;  %v1978_v29 = vld [vmem:[%s2368_s3 + $0x10] sm:$0xff] }
  0x7b   :  { %v679_v14 = vsel %vm1366_vm6, %v1786_v6, %v668_v18  ;;  %v578_v34 = vadd.f32 %v1756_v22, %v568_v21  ;;  %v619_v19 = vmul.f32 %v1773_v40, %v1380_v0  ;;  %v569_v25 = vmul.f32 %v1753_v50, %v1386_v23 }
  0x7c   :  { %1017 = vst.msk [vmem:[%s2369_s4 + $0xe8] sm:$0xff] %vm268_vm3, %v679_v14  ;;  %v669_v24 = vmul.f32 0.16666667, %v660_v61  ;;  %v661_v48 = vmul.f32 %v652_v13, %v625_v58  ;;  %v636_v12 = vadd.f32 3.0, %v627_v49  ;;  %v653_v54 = vmin.f32 %v644_v10, 6.0  ;;  %v1994_v13 = vld [vmem:[%s2368_s3 + $0x58] sm:$0xff] }
  0x7d   :  { %v605_v11 = vadd.f32 %v596_v46, %v578_v34  ;;  %v597_v0 = vmul.f32 %v1759_v20, %v1399_v63  ;;  %v620_v16 = vmul.f32 %v1773_v40, %v1413_v41  ;;  %v579_v27 = vadd.f32 %v1756_v22, %v569_v25  ;;  %v1915_v22 = vld [vmem:[%s2368_s3] sm:$0xff] }
  0x7e   :  { %v680_v30 = vsel %vm1366_vm6, %v1786_v6, %v669_v24  ;;  %v670_v31 = vmul.f32 0.16666667, %v661_v48  ;;  %v645_v51 = vmax.f32 %v636_v12, 0.0  ;;  %v662_v23 = vmul.f32 %v653_v54, %v626_v52  ;;  %v1971_v52 = vld [vmem:[%s2368_s3 + $0x98] sm:$0xff]  ;;  %v2001_v46 = vld [vmem:[%s2368_s3 + $0xa0] sm:$0xff] }
  0x7f   :  { %1018 = vst.msk [vmem:[%s2369_s4 + $0xf0] sm:$0xff] %vm268_vm3, %v680_v30  ;;  %v628_v63 = vadd.f32 %v619_v19, %v605_v11  ;;  %v1904_v50 = vstv %s1854_s11  ;;  %v1907_v41 = vstv %s1849_s10  ;;  %v606_v3 = vadd.f32 %v597_v0, %v579_v27  ;;  %v2008_v24 = vld [vmem:[%s2368_s3 + $0x18] sm:$0xff] }
  0x80   :  { %v681_v20 = vsel %vm1366_vm6, %v1786_v6, %v670_v31  ;;  %v654_v40 = vmin.f32 %v645_v51, 6.0  ;;  %v700_v32 = vmul.f32 %v1915_v22, %v1904_v50  ;;  %v671_v33 = vmul.f32 0.16666667, %v662_v23  ;;  %v2015_v54 = vld [vmem:[%s2368_s3 + $0x60] sm:$0xff]  ;;  %v2022_v0 = vld [vmem:[%s2368_s3 + $0xa8] sm:$0xff] }
  0x81   :  { %1019 = vst.msk [vmem:[%s2369_s4 + $0xf8] sm:$0xff] %vm268_vm3, %v681_v20  ;;  %v637_v38 = vadd.f32 3.0, %v628_v63  ;;  %v1924_v2 = vstv %s1862_s14  ;;  %v1927_v36 = vstv %s1869_s15  ;;  %v629_v9 = vadd.f32 %v620_v16, %v606_v3  ;;  %v2033_v20 = vld [vmem:[%s2368_s3 + $0x20] sm:$0xff] }
  0x82   :  { %v663_v56 = vmul.f32 %v654_v40, %v627_v49  ;;  %v710_v28 = vadd.f32 %v1907_v41, %v700_v32  ;;  %v728_v58 = vmul.f32 %v1933_v37, %v1924_v2  ;;  %v682_v62 = vsel %vm1366_vm6, %v1786_v6, %v671_v33  ;;  %v2040_v3 = vld [vmem:[%s2368_s3 + $0x68] sm:$0xff] }
  0x83   :  { %v646_v35 = vmax.f32 %v637_v38, 0.0  ;;  %v751_v42 = vmul.f32 %v1943_v53, %v1927_v36  ;;  %v1948_v1 = vstv %s1883_s18  ;;  %1020 = vst.msk [vmem:[%s2369_s4 + $0x100] sm:$0xff] %vm268_vm3, %v682_v62  ;;  %v638_v39 = vadd.f32 3.0, %v629_v9  ;;  %v2052_v62 = vld [vmem:[%s2368_s3 + $0xb0] sm:$0xff] }
  0x84   :  { %v672_v4 = vmul.f32 0.16666667, %v663_v56  ;;  %v737_v7 = vadd.f32 %v728_v58, %v710_v28  ;;  %v701_v60 = vmul.f32 %v1957_v15, %v1904_v50  ;;  %v729_v5 = vmul.f32 %v1964_v44, %v1924_v2 }
  0x85   :  { %v655_v47 = vmin.f32 %v646_v35, 6.0  ;;  %v752_v59 = vmul.f32 %v1971_v52, %v1927_v36  ;;  %v702_v8 = vmul.f32 %v1978_v29, %v1904_v50  ;;  %v647_v17 = vmax.f32 %v638_v39, 0.0 }
  0x86   :  { %v683_v57 = vsel %vm1366_vm6, %v1786_v6, %v672_v4  ;;  %v760_v18 = vadd.f32 %v751_v42, %v737_v7  ;;  %v711_v26 = vadd.f32 %v1907_v41, %v701_v60  ;;  %v730_v49 = vmul.f32 %v1994_v13, %v1924_v2  ;;  %v2059_v42 = vld [vmem:[%s2368_s3 + $0x28] sm:$0xff] }
  0x87   :  { %1021 = vst.msk [vmem:[%s2369_s4 + $0x108] sm:$0xff] %vm268_vm3, %v683_v57  ;;  %v664_v21 = vmul.f32 %v655_v47, %v628_v63  ;;  %v712_v61 = vadd.f32 %v1907_v41, %v702_v8  ;;  %v753_v14 = vmul.f32 %v2001_v46, %v1927_v36  ;;  %v656_v10 = vmin.f32 %v647_v17, 6.0  ;;  %v2074_v57 = vld [vmem:[%s2368_s3 + $0x70] sm:$0xff] }
  0x88   :  { %v769_v34 = vadd.f32 3.0, %v760_v18  ;;  %v738_v19 = vadd.f32 %v729_v5, %v711_v26  ;;  %v703_v48 = vmul.f32 %v2008_v24, %v1904_v50  ;;  %v731_v11 = vmul.f32 %v2015_v54, %v1924_v2 }
  0x89   :  { %v673_v12 = vmul.f32 0.16666667, %v664_v21  ;;  %v739_v25 = vadd.f32 %v730_v49, %v712_v61  ;;  %v754_v16 = vmul.f32 %v2022_v0, %v1927_v36  ;;  %v665_v30 = vmul.f32 %v656_v10, %v629_v9  ;;  %v2081_v21 = vld [vmem:[%s2368_s3 + $0xb8] sm:$0xff] }
  0x8a   :  { %v778_v31 = vmax.f32 %v769_v34, 0.0  ;;  %v761_v51 = vadd.f32 %v752_v59, %v738_v19  ;;  %v713_v27 = vadd.f32 %v1907_v41, %v703_v48  ;;  %v704_v40 = vmul.f32 %v2033_v20, %v1904_v50  ;;  %v2088_v34 = vld [vmem:[%s2368_s3 + $0x30] sm:$0xff] }
  0x8b   :  { %v684_v23 = vsel %vm1366_vm6, %v1786_v6, %v673_v12  ;;  %v762_v63 = vadd.f32 %v753_v14, %v739_v25  ;;  %v732_v32 = vmul.f32 %v2040_v3, %v1924_v2  ;;  %v674_v33 = vmul.f32 0.16666667, %v665_v30 }
  0x8c   :  { %1022 = vst.msk [vmem:[%s2369_s4 + $0x110] sm:$0xff] %vm268_vm3, %v684_v23  ;;  %v787_v38 = vmin.f32 %v778_v31, 6.0  ;;  %v770_v56 = vadd.f32 3.0, %v761_v51  ;;  %v740_v9 = vadd.f32 %v731_v11, %v713_v27  ;;  %v714_v58 = vadd.f32 %v1907_v41, %v704_v40  ;;  %v2098_v11 = vld [vmem:[%s2368_s3 + $0x78] sm:$0xff] }
  0x8d   :  { %v771_v28 = vadd.f32 3.0, %v762_v63  ;;  %v755_v35 = vmul.f32 %v2052_v62, %v1927_v36  ;;  %v705_v4 = vmul.f32 %v2059_v42, %v1904_v50  ;;  %v685_v39 = vsel %vm1521_vm10, %v1786_v6, %v674_v33 }
  0x8e   :  { %v796_v7 = vmul.f32 %v787_v38, %v760_v18  ;;  %v779_v60 = vmax.f32 %v770_v56, 0.0  ;;  %v763_v47 = vadd.f32 %v754_v16, %v740_v9  ;;  %1023 = vst.msk [vmem:[%s2369_s4 + $0x118] sm:$0xf] %vm277_vm8, %v685_v39  ;;  %v741_v59 = vadd.f32 %v732_v32, %v714_v58  ;;  %v2112_v32 = vld [vmem:[%s2368_s3 + $0xc0] sm:$0xff] }
  0x8f   :  { %v780_v5 = vmax.f32 %v771_v28, 0.0  ;;  %v715_v8 = vadd.f32 %v1907_v41, %v705_v4  ;;  %v733_v6 = vmul.f32 %v2074_v57, %v1924_v2  ;;  %v756_v61 = vmul.f32 %v2081_v21, %v1927_v36 }
  0x90   :  { %v805_v17 = vmul.f32 0.16666667, %v796_v7  ;;  %v788_v18 = vmin.f32 %v779_v60, 6.0  ;;  %v772_v26 = vadd.f32 3.0, %v763_v47  ;;  %v764_v14 = vadd.f32 %v755_v35, %v741_v59  ;;  %v2134_v7 = vld [vmem:[%s2368_s3 + $0x80] sm:$0xff] }
  0x91   :  { %v789_v49 = vmin.f32 %v780_v5, 6.0  ;;  %v742_v10 = vadd.f32 %v733_v6, %v715_v8  ;;  %v706_v19 = vmul.f32 %v2088_v34, %v1904_v50  ;;  %v734_v16 = vmul.f32 %v2098_v11, %v1924_v2 }
  0x92   :  { %v816_v48 = vsel %vm1354_vm5, %v1948_v1, %v805_v17  ;;  %v797_v12 = vmul.f32 %v788_v18, %v761_v51  ;;  %v781_v25 = vmax.f32 %v772_v26, 0.0  ;;  %v773_v31 = vadd.f32 3.0, %v764_v14  ;;  %v2156_v18 = vld [vmem:[%s2368_s3 + $0xc8] sm:$0xff] }
  0x93   :  { %1029 = vst.msk [vmem:[%s2369_s4 + $0x120] sm:$0xff] %vm268_vm3, %v816_v48  ;;  %v798_v30 = vmul.f32 %v789_v49, %v762_v63  ;;  %v765_v27 = vadd.f32 %v756_v61, %v742_v10  ;;  %v716_v23 = vadd.f32 %v1907_v41, %v706_v19  ;;  %v757_v33 = vmul.f32 %v2112_v32, %v1927_v36  ;;  %v2119_v63 = vld [vmem:[%s2368_s3 + $0x38] sm:$0xff]  ;;  %v2163_v61 = vld [vmem:[%s2368_s3 + $0x40] sm:$0xf] }
  0x94   :  { %v806_v51 = vmul.f32 0.16666667, %v797_v12  ;;  %v790_v40 = vmin.f32 %v781_v25, 6.0  ;;  %v707_v38 = vmul.f32 %v2119_v63, %v1904_v50  ;;  %v782_v9 = vmax.f32 %v773_v31, 0.0  ;;  %v2170_v12 = vld [vmem:[%s2368_s3 + $0x88] sm:$0xf] }
  0x95   :  { %v807_v56 = vmul.f32 0.16666667, %v798_v30  ;;  %v774_v28 = vadd.f32 3.0, %v765_v27  ;;  %v743_v58 = vadd.f32 %v734_v16, %v716_v23  ;;  %v735_v60 = vmul.f32 %v2134_v7, %v1924_v2 }
  0x96   :  { %v817_v35 = vsel %vm1366_vm6, %v1948_v1, %v806_v51  ;;  %v799_v4 = vmul.f32 %v790_v40, %v763_v47  ;;  %v717_v39 = vadd.f32 %v1907_v41, %v707_v38  ;;  %v791_v5 = vmin.f32 %v782_v9, 6.0 }
  0x97   :  { %1030 = vst.msk [vmem:[%s2369_s4 + $0x128] sm:$0xff] %vm268_vm3, %v817_v35  ;;  %v818_v47 = vsel %vm1366_vm6, %v1948_v1, %v807_v56  ;;  %v783_v59 = vmax.f32 %v774_v28, 0.0  ;;  %v766_v8 = vadd.f32 %v757_v33, %v743_v58  ;;  %v758_v26 = vmul.f32 %v2156_v18, %v1927_v36 }
  0x98   :  { %1031 = vst.msk [vmem:[%s2369_s4 + $0x130] sm:$0xff] %vm268_vm3, %v818_v47  ;;  %v808_v6 = vmul.f32 0.16666667, %v799_v4  ;;  %v744_v17 = vadd.f32 %v735_v60, %v717_v39  ;;  %v708_v49 = vmul.f32 %v2163_v61, %v1904_v50  ;;  %v800_v10 = vmul.f32 %v791_v5, %v764_v14  ;;  %v2181_v14 = vld [vmem:[%s2368_s3 + $0xd0] sm:$0xf] }
  0x99   :  { %v792_v19 = vmin.f32 %v783_v59, 6.0  ;;  %v775_v48 = vadd.f32 3.0, %v766_v8  ;;  %v736_v25 = vmul.f32 %v2170_v12, %v1924_v2  ;;  %v759_v31 = vmul.f32 %v2181_v14, %v1927_v36 }
  0x9a   :  { %v819_v16 = vsel %vm1366_vm6, %v1948_v1, %v808_v6  ;;  %v767_v30 = vadd.f32 %v758_v26, %v744_v17  ;;  %v718_v50 = vadd.f32 %v1907_v41, %v708_v49  ;;  %v809_v2 = vmul.f32 0.16666667, %v800_v10 }
  0x9b   :  { %1032 = vst.msk [vmem:[%s2369_s4 + $0x138] sm:$0xff] %vm268_vm3, %v819_v16  ;;  %v801_v23 = vmul.f32 %v792_v19, %v765_v27  ;;  %v784_v51 = vmax.f32 %v775_v48, 0.0  ;;  %v2190_v40 = vstv %s2107_s17  ;;  %v2195_v56 = vstv %s2123_s22 }
  0x9c   :  { %v776_v41 = vadd.f32 3.0, %v767_v30  ;;  %v745_v33 = vadd.f32 %v736_v25, %v718_v50  ;;  %v839_v38 = vmul.f32 %v1915_v22, %v2190_v40  ;;  %v820_v36 = vsel %vm1366_vm6, %v1948_v1, %v809_v2 }
  0x9d   :  { %v810_v9 = vmul.f32 0.16666667, %v801_v23  ;;  %v793_v28 = vmin.f32 %v784_v51, 6.0  ;;  %v2201_v58 = vstv %s2125_s23  ;;  %1033 = vst.msk [vmem:[%s2369_s4 + $0x140] sm:$0xff] %vm268_vm3, %v820_v36  ;;  %v2214_v47 = vstv %s2138_s26 }
  0x9e   :  { %v785_v27 = vmax.f32 %v776_v41, 0.0  ;;  %v768_v35 = vadd.f32 %v759_v31, %v745_v33  ;;  %v849_v4 = vadd.f32 %v2195_v56, %v839_v38  ;;  %v867_v22 = vmul.f32 %v1933_v37, %v2201_v58 }
  0x9f   :  { %v821_v39 = vsel %vm1366_vm6, %v1948_v1, %v810_v9  ;;  %v802_v60 = vmul.f32 %v793_v28, %v766_v8  ;;  %v2217_v5 = vstv %s2147_s27  ;;  %v890_v37 = vmul.f32 %v1943_v53, %v2214_v47 }
  0xa0   :  { %1034 = vst.msk [vmem:[%s2369_s4 + $0x148] sm:$0xff] %vm268_vm3, %v821_v39  ;;  %v794_v59 = vmin.f32 %v785_v27, 6.0  ;;  %v777_v6 = vadd.f32 3.0, %v768_v35  ;;  %v876_v17 = vadd.f32 %v867_v22, %v849_v4  ;;  %v840_v49 = vmul.f32 %v1957_v15, %v2190_v40 }
  0xa1   :  { %v811_v26 = vmul.f32 0.16666667, %v802_v60  ;;  %v868_v8 = vmul.f32 %v1964_v44, %v2201_v58  ;;  %v891_v10 = vmul.f32 %v1971_v52, %v2214_v47  ;;  %v841_v16 = vmul.f32 %v1978_v29, %v2190_v40 }
  0xa2   :  { %v803_v19 = vmul.f32 %v794_v59, %v767_v30  ;;  %v786_v48 = vmax.f32 %v777_v6, 0.0  ;;  %v899_v25 = vadd.f32 %v890_v37, %v876_v17  ;;  %v850_v50 = vadd.f32 %v2195_v56, %v840_v49 }
  0xa3   :  { %v822_v53 = vsel %vm1366_vm6, %v1948_v1, %v811_v26  ;;  %v869_v15 = vmul.f32 %v1994_v13, %v2201_v58  ;;  %v892_v44 = vmul.f32 %v2001_v46, %v2214_v47  ;;  %v851_v31 = vadd.f32 %v2195_v56, %v841_v16 }
  0xa4   :  { %1035 = vst.msk [vmem:[%s2369_s4 + $0x150] sm:$0xff] %vm268_vm3, %v822_v53  ;;  %v812_v52 = vmul.f32 0.16666667, %v803_v19  ;;  %v795_v30 = vmin.f32 %v786_v48, 6.0  ;;  %v908_v29 = vadd.f32 3.0, %v899_v25  ;;  %v877_v2 = vadd.f32 %v868_v8, %v850_v50 }
  0xa5   :  { %v842_v23 = vmul.f32 %v2008_v24, %v2190_v40  ;;  %v870_v13 = vmul.f32 %v2015_v54, %v2201_v58  ;;  %v893_v46 = vmul.f32 %v2022_v0, %v2214_v47  ;;  %v878_v38 = vadd.f32 %v869_v15, %v851_v31 }
  0xa6   :  { %v823_v51 = vsel %vm1366_vm6, %v1948_v1, %v812_v52  ;;  %v804_v41 = vmul.f32 %v795_v30, %v768_v35  ;;  %v917_v33 = vmax.f32 %v908_v29, 0.0  ;;  %v900_v36 = vadd.f32 %v891_v10, %v877_v2 }
  0xa7   :  { %1036 = vst.msk [vmem:[%s2369_s4 + $0x158] sm:$0xff] %vm268_vm3, %v823_v51  ;;  %v852_v24 = vadd.f32 %v2195_v56, %v842_v23  ;;  %v843_v54 = vmul.f32 %v2033_v20, %v2190_v40  ;;  %v871_v0 = vmul.f32 %v2040_v3, %v2201_v58  ;;  %v901_v27 = vadd.f32 %v892_v44, %v878_v38 }
  0xa8   :  { %v813_v9 = vmul.f32 0.16666667, %v804_v41  ;;  %v926_v28 = vmin.f32 %v917_v33, 6.0  ;;  %v894_v35 = vmul.f32 %v2052_v62, %v2214_v47  ;;  %v909_v4 = vadd.f32 3.0, %v900_v36 }
  0xa9   :  { %v879_v22 = vadd.f32 %v870_v13, %v852_v24  ;;  %v853_v39 = vadd.f32 %v2195_v56, %v843_v54  ;;  %v844_v60 = vmul.f32 %v2059_v42, %v2190_v40  ;;  %v910_v6 = vadd.f32 3.0, %v901_v27 }
  0xaa   :  { %v824_v20 = vsel %vm1521_vm10, %v1948_v1, %v813_v9  ;;  %v935_v59 = vmul.f32 %v926_v28, %v899_v25  ;;  %v872_v3 = vmul.f32 %v2074_v57, %v2201_v58  ;;  %v918_v62 = vmax.f32 %v909_v4, 0.0 }
  0xab   :  { %1037 = vst.msk [vmem:[%s2369_s4 + $0x160] sm:$0xf] %vm277_vm8, %v824_v20  ;;  %v902_v17 = vadd.f32 %v893_v46, %v879_v22  ;;  %v880_v37 = vadd.f32 %v871_v0, %v853_v39  ;;  %v854_v26 = vadd.f32 %v2195_v56, %v844_v60  ;;  %v919_v49 = vmax.f32 %v910_v6, 0.0 }
  0xac   :  { %v944_v42 = vmul.f32 0.16666667, %v935_v59  ;;  %v895_v1 = vmul.f32 %v2081_v21, %v2214_v47  ;;  %v845_v8 = vmul.f32 %v2088_v34, %v2190_v40  ;;  %v927_v10 = vmin.f32 %v918_v62, 6.0 }
  0xad   :  { %v911_v57 = vadd.f32 3.0, %v902_v17  ;;  %v903_v19 = vadd.f32 %v894_v35, %v880_v37  ;;  %v881_v48 = vadd.f32 %v872_v3, %v854_v26  ;;  %v928_v16 = vmin.f32 %v919_v49, 6.0 }
  0xae   :  { %v955_v25 = vsel %vm1354_vm5, %v2217_v5, %v944_v42  ;;  %v855_v53 = vadd.f32 %v2195_v56, %v845_v8  ;;  %v873_v50 = vmul.f32 %v2098_v11, %v2201_v58  ;;  %v936_v21 = vmul.f32 %v927_v10, %v900_v36 }
  0xaf   :  { %1043 = vst.msk [vmem:[%s2369_s4 + $0x168] sm:$0xff] %vm268_vm3, %v955_v25  ;;  %v920_v34 = vmax.f32 %v911_v57, 0.0  ;;  %v912_v15 = vadd.f32 3.0, %v903_v19  ;;  %v904_v44 = vadd.f32 %v895_v1, %v881_v48  ;;  %v937_v52 = vmul.f32 %v928_v16, %v901_v27 }
  0xb0   :  { %v882_v30 = vadd.f32 %v873_v50, %v855_v53  ;;  %v896_v45 = vmul.f32 %v2112_v32, %v2214_v47  ;;  %v846_v29 = vmul.f32 %v2119_v63, %v2190_v40  ;;  %v945_v31 = vmul.f32 0.16666667, %v936_v21 }
  0xb1   :  { %v929_v2 = vmin.f32 %v920_v34, 6.0  ;;  %v921_v11 = vmax.f32 %v912_v15, 0.0  ;;  %v913_v23 = vadd.f32 3.0, %v904_v44  ;;  %v946_v13 = vmul.f32 0.16666667, %v937_v52 }
  0xb2   :  { %v905_v46 = vadd.f32 %v896_v45, %v882_v30  ;;  %v856_v51 = vadd.f32 %v2195_v56, %v846_v29  ;;  %v874_v41 = vmul.f32 %v2134_v7, %v2201_v58  ;;  %v956_v33 = vsel %vm1366_vm6, %v2217_v5, %v945_v31 }
  0xb3   :  { %v938_v38 = vmul.f32 %v929_v2, %v902_v17  ;;  %v930_v32 = vmin.f32 %v921_v11, 6.0  ;;  %v922_v36 = vmax.f32 %v913_v23, 0.0  ;;  %1044 = vst.msk [vmem:[%s2369_s4 + $0x170] sm:$0xff] %vm268_vm3, %v956_v33  ;;  %v957_v63 = vsel %vm1366_vm6, %v2217_v5, %v946_v13 }
  0xb4   :  { %v914_v24 = vadd.f32 3.0, %v905_v46  ;;  %v883_v54 = vadd.f32 %v874_v41, %v856_v51  ;;  %v897_v7 = vmul.f32 %v2156_v18, %v2214_v47  ;;  %1045 = vst.msk [vmem:[%s2369_s4 + $0x178] sm:$0xff] %vm268_vm3, %v957_v63  ;;  %v847_v27 = vmul.f32 %v2163_v61, %v2190_v40 }
  0xb5   :  { %v947_v0 = vmul.f32 0.16666667, %v938_v38  ;;  %v939_v9 = vmul.f32 %v930_v32, %v903_v19  ;;  %v931_v28 = vmin.f32 %v922_v36, 6.0  ;;  %v875_v22 = vmul.f32 %v2170_v12, %v2201_v58 }
  0xb6   :  { %v923_v35 = vmax.f32 %v914_v24, 0.0  ;;  %v906_v4 = vadd.f32 %v897_v7, %v883_v54  ;;  %v898_v39 = vmul.f32 %v2181_v14, %v2214_v47  ;;  %v857_v59 = vadd.f32 %v2195_v56, %v847_v27 }
  0xb7   :  { %v958_v18 = vsel %vm1366_vm6, %v2217_v5, %v947_v0  ;;  %v948_v60 = vmul.f32 0.16666667, %v939_v9  ;;  %v940_v20 = vmul.f32 %v931_v28, %v904_v44 }
  0xb8   :  { %1046 = vst.msk [vmem:[%s2369_s4 + $0x180] sm:$0xff] %vm268_vm3, %v958_v18  ;;  %v932_v61 = vmin.f32 %v923_v35, 6.0  ;;  %v915_v40 = vadd.f32 3.0, %v906_v4  ;;  %v884_v58 = vadd.f32 %v875_v22, %v857_v59 }
  0xb9   :  { %v959_v12 = vsel %vm1366_vm6, %v2217_v5, %v948_v60  ;;  %v949_v14 = vmul.f32 0.16666667, %v940_v20 }
  0xba   :  { %1047 = vst.msk [vmem:[%s2369_s4 + $0x188] sm:$0xff] %vm268_vm3, %v959_v12  ;;  %v941_v47 = vmul.f32 %v932_v61, %v905_v46  ;;  %v924_v56 = vmax.f32 %v915_v40, 0.0  ;;  %v907_v3 = vadd.f32 %v898_v39, %v884_v58 }
  0xbb   :  { %v960_v6 = vsel %vm1366_vm6, %v2217_v5, %v949_v14 }
  0xbc   :  { %1048 = vst.msk [vmem:[%s2369_s4 + $0x190] sm:$0xff] %vm268_vm3, %v960_v6  ;;  %v950_v62 = vmul.f32 0.16666667, %v941_v47  ;;  %v933_v17 = vmin.f32 %v924_v56, 6.0  ;;  %v916_v37 = vadd.f32 3.0, %v907_v3 }
  0xbe   :  { %v961_v26 = vsel %vm1366_vm6, %v2217_v5, %v950_v62  ;;  %v942_v42 = vmul.f32 %v933_v17, %v906_v4  ;;  %v925_v49 = vmax.f32 %v916_v37, 0.0 }
  0xbf   :  { %1049 = vst.msk [vmem:[%s2369_s4 + $0x198] sm:$0xff] %vm268_vm3, %v961_v26 }
  0xc0   :  { %v951_v1 = vmul.f32 0.16666667, %v942_v42  ;;  %v934_v8 = vmin.f32 %v925_v49, 6.0 }
  0xc2   :  { %v962_v10 = vsel %vm1366_vm6, %v2217_v5, %v951_v1  ;;  %v943_v57 = vmul.f32 %v934_v8, %v907_v3 }
  0xc3   :  { %1050 = vst.msk [vmem:[%s2369_s4 + $0x1a0] sm:$0xff] %vm268_vm3, %v962_v10 }
  0xc4   :  { %v952_v19 = vmul.f32 0.16666667, %v943_v57 }
  0xc6   :  { %v963_v48 = vsel %vm1521_vm10, %v2217_v5, %v952_v19 }
  0xc7   :  { %1051 = vst.msk [vmem:[%s2369_s4 + $0x1a8] sm:$0xf] %vm277_vm8, %v963_v48 }
  0xc8   :  { %978 = vsyncpa [#allocation3], 1 }
  0xc9   :  { %979 = vsyncpa [#allocation5], 1 }

</bundles_post_ra>
